<compile_context>
chip_gen: v7x
topology: tpu7x:2x2x1
jax: 0.10.0
libtpu: 0.0.40
codegen_flags: <defaults>
</compile_context>

<pallas_src>
from functools import partial

import jax
import jax.numpy as jnp
from jax.experimental import pallas as pl
from jax.experimental.pallas import tpu as pltpu

EPS = 1e-5


# ----------------------------- in-kernel helpers -----------------------------

def _layernorm(x, gamma, beta):
    mean = jnp.mean(x, axis=-1, keepdims=True)
    var = jnp.mean((x - mean) ** 2, axis=-1, keepdims=True)
    return (x - mean) * jax.lax.rsqrt(var + EPS) * gamma + beta


def _erf(x):
    # Abramowitz & Stegun 7.1.26 (max abs error ~1.5e-7).  Only uses primitives
    # with guaranteed Mosaic lowerings (abs / div / exp / select).
    p = 0.3275911
    a1, a2, a3, a4, a5 = (0.254829592, -0.284496736, 1.421413741,
                          -1.453152027, 1.061405429)
    ax = jnp.abs(x)
    t = 1.0 / (1.0 + p * ax)
    poly = ((((a5 * t + a4) * t + a3) * t + a2) * t + a1) * t
    y = 1.0 - poly * jnp.exp(-ax * ax)
    return jnp.where(x >= 0, y, -y)


def _gelu_exact(x):
    # torch.nn.functional.gelu default (erf-based).
    return 0.5 * x * (1.0 + _erf(x * 0.7071067811865476))


# --------------------------------- fused kernel -------------------------------

def encoder_layer_kernel(*refs, num_heads, matmul_dtype, pre_ln):
    """One full BART encoder layer (optionally preceded by layernorm_embedding)."""
    if pre_ln:
        (x_ref, g0_ref, b0_ref, *rest) = refs
    else:
        (x_ref, *rest) = refs
        g0_ref = b0_ref = None
    (wq_ref, bq_ref, wk_ref, bk_ref, wv_ref, bv_ref, wo3_ref, bo_ref,
     g1_ref, b1_ref, w1_ref, c1_ref, w2_ref, c2_ref, g2_ref, b2_ref,
     o_ref) = rest

    md = jnp.dtype(matmul_dtype)
    approx_recip = md != jnp.dtype(jnp.float32)   # EUP reciprocal in the fast path

    x = x_ref[0].astype(jnp.float32)              # (S, H): residual / stats in f32
    if pre_ln:                                    # folded layernorm_embedding (layer 0)
        x = _layernorm(x, g0_ref[...], b0_ref[...])

    S, H = x.shape
    dH = H // num_heads

    # ---------------- self-attention ----------------
    x_m = x.astype(md)
    # Weights pre-transposed to (in, out); 1/sqrt(dH) already folded into wq/bq.
    q = jnp.dot(x_m, wq_ref[...], preferred_element_type=jnp.float32) + bq_ref[...]
    k = jnp.dot(x_m, wk_ref[...], preferred_element_type=jnp.float32) + bk_ref[...]
    v = jnp.dot(x_m, wv_ref[...], preferred_element_type=jnp.float32) + bv_ref[...]

    def split_heads(t):
        # (S, H) -> (num_heads, S, dH) from static lane slices (no lane reshape).
        return jnp.stack(
            [t[:, h * dH:(h + 1) * dH] for h in range(num_heads)], axis=0
        ).astype(md)

    qh, kh, vh = split_heads(q), split_heads(k), split_heads(v)

    # Batched head math: one scores einsum + one context einsum for all heads.
    scores = jnp.einsum("hqd,hkd->hqk", qh, kh,
                        preferred_element_type=jnp.float32)        # (nh, S, S)
    m = jnp.max(scores, axis=-1, keepdims=True)
    e = jnp.exp(scores - m)
    probs = e * pl.reciprocal(jnp.sum(e, axis=-1, keepdims=True), approx=approx_recip)

    ctx = jnp.einsum("hqk,hkd->hqd", probs.astype(md), vh,
                     preferred_element_type=jnp.float32)           # (nh, S, dH)

    # Output projection without any lane concatenate: Wo arrives pre-reshaped as
    # (num_heads, dH, H); accumulate per-head contributions (static leading index).
    hqo = jnp.einsum("hqd,hdo->hqo", ctx.astype(md), wo3_ref[...],
                     preferred_element_type=jnp.float32)           # (nh, S, H)
    attn = hqo[0]
    for h in range(1, num_heads):
        attn = attn + hqo[h]
    attn = attn + bo_ref[...]

    x = _layernorm(x + attn, g1_ref[...], b1_ref[...])

    # ---------------- feed-forward ----------------
    h1 = jnp.dot(x.astype(md), w1_ref[...], preferred_element_type=jnp.float32) + c1_ref[...]
    h1 = _gelu_exact(h1)
    y = jnp.dot(h1.astype(md), w2_ref[...], preferred_element_type=jnp.float32) + c2_ref[...]
    o_ref[0] = _layernorm(x + y, g2_ref[...], b2_ref[...]).astype(o_ref.dtype)


# ----------------------------------- wrapper -----------------------------------

def bart_blocks_forward(x, params, *, num_heads,
                        matmul_dtype=jnp.bfloat16,
                        vmem_limit_bytes=None):
    B, S, H = x.shape
    dH = H // num_heads
    scale = 1.0 / (dH ** 0.5)
    md = jnp.dtype(matmul_dtype)

    xspec = pl.BlockSpec((1, S, H), lambda b: (b, 0, 0))

    def full_spec(a):
        zeros = (0,) * a.ndim
        return pl.BlockSpec(a.shape, lambda b, _z=zeros: _z)

    cp_kwargs = dict(dimension_semantics=("parallel",))   # batch across v7x's 2 TCs
    if vmem_limit_bytes is not None:
        cp_kwargs["vmem_limit_bytes"] = vmem_limit_bytes   # raise for big weights
    cparams = pltpu.CompilerParams(**cp_kwargs)

    for li, L in enumerate(params["layers"]):
        pre_ln = (li == 0)

        # Pre-transpose all weights to (in, out) OUTSIDE the kernel (no in-kernel
        # .T / reshape), fold the softmax scale into the Q projection, and cast the
        # weight matrices to the MXU dtype (halves weight DMA bytes for bf16).
        wq = (L["wq"] * scale).T.astype(md)
        bq = (L["bq"] * scale).astype(jnp.float32)
        wk = L["wk"].T.astype(md)
        wv = L["wv"].T.astype(md)
        wo3 = L["wo"].T.reshape(num_heads, dH, H).astype(md)   # per-head rows of Wo^T
        w1 = L["w1"].T.astype(md)
        w2 = L["w2"].T.astype(md)

        args = []
        if pre_ln:
            args += [params["ln_emb_g"], params["ln_emb_b"]]
        args += [wq, bq, wk, L["bk"], wv, L["bv"], wo3, L["bo"],
                 L["ln1_g"], L["ln1_b"],
                 w1, L["b1"], w2, L["b2"], L["ln2_g"], L["ln2_b"]]

        x = pl.pallas_call(
            partial(encoder_layer_kernel, num_heads=num_heads, matmul_dtype=md,
                    pre_ln=pre_ln),
            out_shape=jax.ShapeDtypeStruct((B, S, H), x.dtype),
            grid=(B,),
            in_specs=[xspec] + [full_spec(a) for a in args],
            out_specs=xspec,
            compiler_params=cparams,
        )(x, *args)

    return x


# ----------------------------- pure-JAX reference -----------------------------

def reference_forward(x, params, *, num_heads):
    def ln(x, g, b):
        m = x.mean(-1, keepdims=True)
        v = ((x - m) ** 2).mean(-1, keepdims=True)
        return (x - m) / jnp.sqrt(v + EPS) * g + b

    x = ln(x, params["ln_emb_g"][0], params["ln_emb_b"][0])
    for L in params["layers"]:
        B, S, H = x.shape
        dH = H // num_heads
        q = (x @ L["wq"].T + L["bq"][0]) * (dH ** -0.5)
        k = x @ L["wk"].T + L["bk"][0]
        v = x @ L["wv"].T + L["bv"][0]
        q = q.reshape(B, S, num_heads, dH).transpose(0, 2, 1, 3)
        k = k.reshape(B, S, num_heads, dH).transpose(0, 2, 1, 3)
        v = v.reshape(B, S, num_heads, dH).transpose(0, 2, 1, 3)
        sc = jnp.einsum("bhqd,bhkd->bhqk", q, k)
        pr = jax.nn.softmax(sc, axis=-1)
        ctx = jnp.einsum("bhqk,bhkd->bhqd", pr, v).transpose(0, 2, 1, 3).reshape(B, S, H)
        x = ln(x + ctx @ L["wo"].T + L["bo"][0], L["ln1_g"][0], L["ln1_b"][0])
        h = jax.nn.gelu(x @ L["w1"].T + L["b1"][0], approximate=False)
        x = ln(x + h @ L["w2"].T + L["b2"][0], L["ln2_g"][0], L["ln2_b"][0])
    return x


# ----------------------------------- params ------------------------------------

def make_params(key, hidden, ffn, num_layers):
    std = 0.02

    def nrm(k, shape):
        return jax.random.normal(k, shape, jnp.float32) * std

    keys = jax.random.split(key, num_layers + 1)
    params = {
        "ln_emb_g": jnp.ones((1, hidden), jnp.float32),
        "ln_emb_b": jnp.zeros((1, hidden), jnp.float32),
        "layers": [],
    }
    for li in range(num_layers):
        ks = jax.random.split(keys[li], 12)
        params["layers"].append({
            "wq": nrm(ks[0], (hidden, hidden)), "bq": nrm(ks[1], (1, hidden)),
            "wk": nrm(ks[2], (hidden, hidden)), "bk": nrm(ks[3], (1, hidden)),
            "wv": nrm(ks[4], (hidden, hidden)), "bv": nrm(ks[5], (1, hidden)),
            "wo": nrm(ks[6], (hidden, hidden)), "bo": nrm(ks[7], (1, hidden)),
            "ln1_g": jnp.ones((1, hidden), jnp.float32),
            "ln1_b": jnp.zeros((1, hidden), jnp.float32),
            "w1": nrm(ks[8], (ffn, hidden)),  "b1": nrm(ks[9], (1, ffn)),
            "w2": nrm(ks[10], (hidden, ffn)), "b2": nrm(ks[11], (1, hidden)),
            "ln2_g": jnp.ones((1, hidden), jnp.float32),
            "ln2_b": jnp.zeros((1, hidden), jnp.float32),
        })
    return params


# ------------------------------------ main --------------------------------------

if __name__ == "__main__":
    B, S, H = 2, 8, 32           # batch, seq, hidden (toy; real BART uses H=768)
    NUM_HEADS = 4
    FFN = 64
    NUM_LAYERS = 2

    key = jax.random.PRNGKey(0)
    kx, kp = jax.random.split(key)
    x = jax.random.normal(kx, (B, S, H), jnp.float32)
    params = make_params(kp, H, FFN, NUM_LAYERS)

    ref = reference_forward(x, params, num_heads=NUM_HEADS)

    # Exact-precision path (tight check vs. the f32 reference).
    out_f32 = jax.block_until_ready(
        bart_blocks_forward(x, params, num_heads=NUM_HEADS, matmul_dtype=jnp.float32))
    # Production path: bf16 MXU operands, f32 accumulation / statistics.
    out_bf16 = jax.block_until_ready(
        bart_blocks_forward(x, params, num_heads=NUM_HEADS, matmul_dtype=jnp.bfloat16))

    assert out_f32.shape == (B, S, H)
    assert jnp.allclose(out_f32, ref, atol=1e-3, rtol=1e-3), "f32 mismatch vs reference"
    assert jnp.allclose(out_bf16, ref, atol=2e-2, rtol=2e-2), "bf16 mismatch vs reference"

    print("KERNEL_OK")
</pallas_src>

<mosaic_0001>
module attributes {stable_mosaic.version = 11 : i64} {
  func.func @encoder_layer_kernel(%arg0: i32, %arg1: memref<1x8x32xf32, #tpu.memory_space<vmem>>, %arg2: memref<1x32xf32, #tpu.memory_space<vmem>>, %arg3: memref<1x32xf32, #tpu.memory_space<vmem>>, %arg4: memref<32x32xf32, #tpu.memory_space<vmem>>, %arg5: memref<1x32xf32, #tpu.memory_space<vmem>>, %arg6: memref<32x32xf32, #tpu.memory_space<vmem>>, %arg7: memref<1x32xf32, #tpu.memory_space<vmem>>, %arg8: memref<32x32xf32, #tpu.memory_space<vmem>>, %arg9: memref<1x32xf32, #tpu.memory_space<vmem>>, %arg10: memref<4x8x32xf32, #tpu.memory_space<vmem>>, %arg11: memref<1x32xf32, #tpu.memory_space<vmem>>, %arg12: memref<1x32xf32, #tpu.memory_space<vmem>>, %arg13: memref<1x32xf32, #tpu.memory_space<vmem>>, %arg14: memref<32x64xf32, #tpu.memory_space<vmem>>, %arg15: memref<1x64xf32, #tpu.memory_space<vmem>>, %arg16: memref<64x32xf32, #tpu.memory_space<vmem>>, %arg17: memref<1x32xf32, #tpu.memory_space<vmem>>, %arg18: memref<1x32xf32, #tpu.memory_space<vmem>>, %arg19: memref<1x32xf32, #tpu.memory_space<vmem>>, %arg20: memref<1x8x32xf32, #tpu.memory_space<vmem>>) attributes {dimension_semantics = [#tpu.dimension_semantics<parallel>], iteration_bounds = array<i64: 2>, scalar_prefetch = 0 : i64, scratch_operands = 0 : i64, tpu.core_type = #tpu.core_type<tc>, window_params = [{transform_indices = @transform_0, window_bounds = array<i64: 1, 8, 32>}, {pipeline_mode = #tpu.pipeline_mode<synchronous>, transform_indices = @transform_1, window_bounds = array<i64: 1, 32>}, {pipeline_mode = #tpu.pipeline_mode<synchronous>, transform_indices = @transform_2, window_bounds = array<i64: 1, 32>}, {pipeline_mode = #tpu.pipeline_mode<synchronous>, transform_indices = @transform_3, window_bounds = array<i64: 32, 32>}, {pipeline_mode = #tpu.pipeline_mode<synchronous>, transform_indices = @transform_4, window_bounds = array<i64: 1, 32>}, {pipeline_mode = #tpu.pipeline_mode<synchronous>, transform_indices = @transform_5, window_bounds = array<i64: 32, 32>}, {pipeline_mode = #tpu.pipeline_mode<synchronous>, transform_indices = @transform_6, window_bounds = array<i64: 1, 32>}, {pipeline_mode = #tpu.pipeline_mode<synchronous>, transform_indices = @transform_7, window_bounds = array<i64: 32, 32>}, {pipeline_mode = #tpu.pipeline_mode<synchronous>, transform_indices = @transform_8, window_bounds = array<i64: 1, 32>}, {pipeline_mode = #tpu.pipeline_mode<synchronous>, transform_indices = @transform_9, window_bounds = array<i64: 4, 8, 32>}, {pipeline_mode = #tpu.pipeline_mode<synchronous>, transform_indices = @transform_10, window_bounds = array<i64: 1, 32>}, {pipeline_mode = #tpu.pipeline_mode<synchronous>, transform_indices = @transform_11, window_bounds = array<i64: 1, 32>}, {pipeline_mode = #tpu.pipeline_mode<synchronous>, transform_indices = @transform_12, window_bounds = array<i64: 1, 32>}, {pipeline_mode = #tpu.pipeline_mode<synchronous>, transform_indices = @transform_13, window_bounds = array<i64: 32, 64>}, {pipeline_mode = #tpu.pipeline_mode<synchronous>, transform_indices = @transform_14, window_bounds = array<i64: 1, 64>}, {pipeline_mode = #tpu.pipeline_mode<synchronous>, transform_indices = @transform_15, window_bounds = array<i64: 64, 32>}, {pipeline_mode = #tpu.pipeline_mode<synchronous>, transform_indices = @transform_16, window_bounds = array<i64: 1, 32>}, {pipeline_mode = #tpu.pipeline_mode<synchronous>, transform_indices = @transform_17, window_bounds = array<i64: 1, 32>}, {pipeline_mode = #tpu.pipeline_mode<synchronous>, transform_indices = @transform_18, window_bounds = array<i64: 1, 32>}, {transform_indices = @transform_19, window_bounds = array<i64: 1, 8, 32>}]} {
    %c0 = arith.constant 0 : index
    %c0_0 = arith.constant 0 : index
    %c0_1 = arith.constant 0 : index
    %0 = vector.load %arg1[%c0, %c0_0, %c0_1] : memref<1x8x32xf32, #tpu.memory_space<vmem>>, vector<1x8x32xf32>
    %1 = vector.shape_cast %0 : vector<1x8x32xf32> to vector<8x32xf32>
    %c0_2 = arith.constant 0 : index
    %c0_3 = arith.constant 0 : index
    %2 = vector.load %arg2[%c0_2, %c0_3] : memref<1x32xf32, #tpu.memory_space<vmem>>, vector<1x32xf32>
    %c0_4 = arith.constant 0 : index
    %c0_5 = arith.constant 0 : index
    %3 = vector.load %arg3[%c0_4, %c0_5] : memref<1x32xf32, #tpu.memory_space<vmem>>, vector<1x32xf32>
    %cst = arith.constant dense<0.000000e+00> : vector<8xf32>
    %4 = vector.multi_reduction <add>, %1, %cst [1] : vector<8x32xf32> to vector<8xf32>
    %5 = vector.shape_cast %4 : vector<8xf32> to vector<8x1xf32>
    %cst_6 = arith.constant 3.200000e+01 : f32
    %6 = vector.broadcast %cst_6 : f32 to vector<8x1xf32>
    %7 = arith.divf %5, %6 : vector<8x1xf32>
    %8 = vector.broadcast %7 : vector<8x1xf32> to vector<8x32xf32>
    %9 = arith.subf %1, %8 : vector<8x32xf32>
    %10 = arith.mulf %9, %9 : vector<8x32xf32>
    %cst_7 = arith.constant dense<0.000000e+00> : vector<8xf32>
    %11 = vector.multi_reduction <add>, %10, %cst_7 [1] : vector<8x32xf32> to vector<8xf32>
    %12 = vector.shape_cast %11 : vector<8xf32> to vector<8x1xf32>
    %cst_8 = arith.constant 3.200000e+01 : f32
    %13 = vector.broadcast %cst_8 : f32 to vector<8x1xf32>
    %14 = arith.divf %12, %13 : vector<8x1xf32>
    %15 = vector.broadcast %7 : vector<8x1xf32> to vector<8x32xf32>
    %16 = arith.subf %1, %15 : vector<8x32xf32>
    %cst_9 = arith.constant 9.99999974E-6 : f32
    %17 = vector.broadcast %cst_9 : f32 to vector<8x1xf32>
    %18 = arith.addf %14, %17 : vector<8x1xf32>
    %19 = math.rsqrt %18 : vector<8x1xf32>
    %20 = vector.broadcast %19 : vector<8x1xf32> to vector<8x32xf32>
    %21 = arith.mulf %16, %20 : vector<8x32xf32>
    %22 = vector.broadcast %2 : vector<1x32xf32> to vector<8x32xf32>
    %23 = arith.mulf %21, %22 : vector<8x32xf32>
    %24 = vector.broadcast %3 : vector<1x32xf32> to vector<8x32xf32>
    %25 = arith.addf %23, %24 : vector<8x32xf32>
    %c0_10 = arith.constant 0 : index
    %c0_11 = arith.constant 0 : index
    %26 = vector.load %arg4[%c0_10, %c0_11] : memref<32x32xf32, #tpu.memory_space<vmem>>, vector<32x32xf32>
    %cst_12 = arith.constant dense<0.000000e+00> : vector<8x32xf32>
    %27 = tpu.matmul %25, %26, %cst_12 {dimension_numbers = #tpu.dot_dimension_numbers<[1], [0], [0], [1], [0, 0, 1, 1], [], []>} : vector<8x32xf32>, vector<32x32xf32>, vector<8x32xf32> -> vector<8x32xf32>
    %c0_13 = arith.constant 0 : index
    %c0_14 = arith.constant 0 : index
    %28 = vector.load %arg5[%c0_13, %c0_14] : memref<1x32xf32, #tpu.memory_space<vmem>>, vector<1x32xf32>
    %29 = vector.broadcast %28 : vector<1x32xf32> to vector<8x32xf32>
    %30 = arith.addf %27, %29 : vector<8x32xf32>
    %c0_15 = arith.constant 0 : index
    %c0_16 = arith.constant 0 : index
    %31 = vector.load %arg6[%c0_15, %c0_16] : memref<32x32xf32, #tpu.memory_space<vmem>>, vector<32x32xf32>
    %cst_17 = arith.constant dense<0.000000e+00> : vector<8x32xf32>
    %32 = tpu.matmul %25, %31, %cst_17 {dimension_numbers = #tpu.dot_dimension_numbers<[1], [0], [0], [1], [0, 0, 1, 1], [], []>} : vector<8x32xf32>, vector<32x32xf32>, vector<8x32xf32> -> vector<8x32xf32>
    %c0_18 = arith.constant 0 : index
    %c0_19 = arith.constant 0 : index
    %33 = vector.load %arg7[%c0_18, %c0_19] : memref<1x32xf32, #tpu.memory_space<vmem>>, vector<1x32xf32>
    %34 = vector.broadcast %33 : vector<1x32xf32> to vector<8x32xf32>
    %35 = arith.addf %32, %34 : vector<8x32xf32>
    %c0_20 = arith.constant 0 : index
    %c0_21 = arith.constant 0 : index
    %36 = vector.load %arg8[%c0_20, %c0_21] : memref<32x32xf32, #tpu.memory_space<vmem>>, vector<32x32xf32>
    %cst_22 = arith.constant dense<0.000000e+00> : vector<8x32xf32>
    %37 = tpu.matmul %25, %36, %cst_22 {dimension_numbers = #tpu.dot_dimension_numbers<[1], [0], [0], [1], [0, 0, 1, 1], [], []>} : vector<8x32xf32>, vector<32x32xf32>, vector<8x32xf32> -> vector<8x32xf32>
    %c0_23 = arith.constant 0 : index
    %c0_24 = arith.constant 0 : index
    %38 = vector.load %arg9[%c0_23, %c0_24] : memref<1x32xf32, #tpu.memory_space<vmem>>, vector<1x32xf32>
    %39 = vector.broadcast %38 : vector<1x32xf32> to vector<8x32xf32>
    %40 = arith.addf %37, %39 : vector<8x32xf32>
    %41 = vector.extract_strided_slice %30 {offsets = [0, 0], sizes = [8, 8], strides = [1, 1]} : vector<8x32xf32> to vector<8x8xf32>
    %42 = vector.extract_strided_slice %30 {offsets = [0, 8], sizes = [8, 8], strides = [1, 1]} : vector<8x32xf32> to vector<8x8xf32>
    %43 = vector.extract_strided_slice %30 {offsets = [0, 16], sizes = [8, 8], strides = [1, 1]} : vector<8x32xf32> to vector<8x8xf32>
    %44 = vector.extract_strided_slice %30 {offsets = [0, 24], sizes = [8, 8], strides = [1, 1]} : vector<8x32xf32> to vector<8x8xf32>
    %45 = vector.shape_cast %41 : vector<8x8xf32> to vector<1x8x8xf32>
    %46 = vector.shape_cast %42 : vector<8x8xf32> to vector<1x8x8xf32>
    %47 = vector.shape_cast %43 : vector<8x8xf32> to vector<1x8x8xf32>
    %48 = vector.shape_cast %44 : vector<8x8xf32> to vector<1x8x8xf32>
    %49 = tpu.concatenate %45, %46, %47, %48 in 0 : vector<1x8x8xf32>, vector<1x8x8xf32>, vector<1x8x8xf32>, vector<1x8x8xf32> -> vector<4x8x8xf32>
    %50 = vector.extract_strided_slice %35 {offsets = [0, 0], sizes = [8, 8], strides = [1, 1]} : vector<8x32xf32> to vector<8x8xf32>
    %51 = vector.extract_strided_slice %35 {offsets = [0, 8], sizes = [8, 8], strides = [1, 1]} : vector<8x32xf32> to vector<8x8xf32>
    %52 = vector.extract_strided_slice %35 {offsets = [0, 16], sizes = [8, 8], strides = [1, 1]} : vector<8x32xf32> to vector<8x8xf32>
    %53 = vector.extract_strided_slice %35 {offsets = [0, 24], sizes = [8, 8], strides = [1, 1]} : vector<8x32xf32> to vector<8x8xf32>
    %54 = vector.shape_cast %50 : vector<8x8xf32> to vector<1x8x8xf32>
    %55 = vector.shape_cast %51 : vector<8x8xf32> to vector<1x8x8xf32>
    %56 = vector.shape_cast %52 : vector<8x8xf32> to vector<1x8x8xf32>
    %57 = vector.shape_cast %53 : vector<8x8xf32> to vector<1x8x8xf32>
    %58 = tpu.concatenate %54, %55, %56, %57 in 0 : vector<1x8x8xf32>, vector<1x8x8xf32>, vector<1x8x8xf32>, vector<1x8x8xf32> -> vector<4x8x8xf32>
    %59 = vector.extract_strided_slice %40 {offsets = [0, 0], sizes = [8, 8], strides = [1, 1]} : vector<8x32xf32> to vector<8x8xf32>
    %60 = vector.extract_strided_slice %40 {offsets = [0, 8], sizes = [8, 8], strides = [1, 1]} : vector<8x32xf32> to vector<8x8xf32>
    %61 = vector.extract_strided_slice %40 {offsets = [0, 16], sizes = [8, 8], strides = [1, 1]} : vector<8x32xf32> to vector<8x8xf32>
    %62 = vector.extract_strided_slice %40 {offsets = [0, 24], sizes = [8, 8], strides = [1, 1]} : vector<8x32xf32> to vector<8x8xf32>
    %63 = vector.shape_cast %59 : vector<8x8xf32> to vector<1x8x8xf32>
    %64 = vector.shape_cast %60 : vector<8x8xf32> to vector<1x8x8xf32>
    %65 = vector.shape_cast %61 : vector<8x8xf32> to vector<1x8x8xf32>
    %66 = vector.shape_cast %62 : vector<8x8xf32> to vector<1x8x8xf32>
    %67 = tpu.concatenate %63, %64, %65, %66 in 0 : vector<1x8x8xf32>, vector<1x8x8xf32>, vector<1x8x8xf32>, vector<1x8x8xf32> -> vector<4x8x8xf32>
    "tpu.trace_start"() <{level = 10 : i32, message = "hqd,hkd->hqk"}> : () -> ()
    %cst_25 = arith.constant dense<0.000000e+00> : vector<4x8x8xf32>
    %68 = tpu.matmul %49, %58, %cst_25 {dimension_numbers = #tpu.dot_dimension_numbers<[2], [2], [1], [1], [0, 0, 0, 1, 1, 1], [0], [0]>} : vector<4x8x8xf32>, vector<4x8x8xf32>, vector<4x8x8xf32> -> vector<4x8x8xf32>
    "tpu.trace_stop"() : () -> ()
    %cst_26 = arith.constant dense<0xFF800000> : vector<4x8xf32>
    %69 = vector.multi_reduction <maximumf>, %68, %cst_26 [2] : vector<4x8x8xf32> to vector<4x8xf32>
    %70 = vector.shape_cast %69 : vector<4x8xf32> to vector<4x8x1xf32>
    %71 = vector.broadcast %70 : vector<4x8x1xf32> to vector<4x8x8xf32>
    %72 = arith.subf %68, %71 : vector<4x8x8xf32>
    %73 = math.exp %72 : vector<4x8x8xf32>
    %cst_27 = arith.constant dense<0.000000e+00> : vector<4x8xf32>
    %74 = vector.multi_reduction <add>, %73, %cst_27 [2] : vector<4x8x8xf32> to vector<4x8xf32>
    %75 = vector.shape_cast %74 : vector<4x8xf32> to vector<4x8x1xf32>
    %76 = tpu.reciprocal %75 : vector<4x8x1xf32> -> vector<4x8x1xf32>
    %77 = vector.broadcast %76 : vector<4x8x1xf32> to vector<4x8x8xf32>
    %78 = arith.mulf %73, %77 : vector<4x8x8xf32>
    "tpu.trace_start"() <{level = 10 : i32, message = "hqk,hkd->hqd"}> : () -> ()
    %cst_28 = arith.constant dense<0.000000e+00> : vector<4x8x8xf32>
    %79 = tpu.matmul %78, %67, %cst_28 {dimension_numbers = #tpu.dot_dimension_numbers<[2], [1], [1], [2], [0, 0, 0, 1, 1, 2], [0], [0]>} : vector<4x8x8xf32>, vector<4x8x8xf32>, vector<4x8x8xf32> -> vector<4x8x8xf32>
    "tpu.trace_stop"() : () -> ()
    %c0_29 = arith.constant 0 : index
    %c0_30 = arith.constant 0 : index
    %c0_31 = arith.constant 0 : index
    %80 = vector.load %arg10[%c0_29, %c0_30, %c0_31] : memref<4x8x32xf32, #tpu.memory_space<vmem>>, vector<4x8x32xf32>
    "tpu.trace_start"() <{level = 10 : i32, message = "hqd,hdo->hqo"}> : () -> ()
    %cst_32 = arith.constant dense<0.000000e+00> : vector<4x8x32xf32>
    %81 = tpu.matmul %79, %80, %cst_32 {dimension_numbers = #tpu.dot_dimension_numbers<[2], [1], [1], [2], [0, 0, 0, 1, 1, 2], [0], [0]>} : vector<4x8x8xf32>, vector<4x8x32xf32>, vector<4x8x32xf32> -> vector<4x8x32xf32>
    "tpu.trace_stop"() : () -> ()
    %82 = vector.extract_strided_slice %81 {offsets = [0, 0, 0], sizes = [1, 8, 32], strides = [1, 1, 1]} : vector<4x8x32xf32> to vector<1x8x32xf32>
    %83 = vector.shape_cast %82 : vector<1x8x32xf32> to vector<8x32xf32>
    %84 = vector.extract_strided_slice %81 {offsets = [1, 0, 0], sizes = [1, 8, 32], strides = [1, 1, 1]} : vector<4x8x32xf32> to vector<1x8x32xf32>
    %85 = vector.shape_cast %84 : vector<1x8x32xf32> to vector<8x32xf32>
    %86 = arith.addf %83, %85 : vector<8x32xf32>
    %87 = vector.extract_strided_slice %81 {offsets = [2, 0, 0], sizes = [1, 8, 32], strides = [1, 1, 1]} : vector<4x8x32xf32> to vector<1x8x32xf32>
    %88 = vector.shape_cast %87 : vector<1x8x32xf32> to vector<8x32xf32>
    %89 = arith.addf %86, %88 : vector<8x32xf32>
    %90 = vector.extract_strided_slice %81 {offsets = [3, 0, 0], sizes = [1, 8, 32], strides = [1, 1, 1]} : vector<4x8x32xf32> to vector<1x8x32xf32>
    %91 = vector.shape_cast %90 : vector<1x8x32xf32> to vector<8x32xf32>
    %92 = arith.addf %89, %91 : vector<8x32xf32>
    %c0_33 = arith.constant 0 : index
    %c0_34 = arith.constant 0 : index
    %93 = vector.load %arg11[%c0_33, %c0_34] : memref<1x32xf32, #tpu.memory_space<vmem>>, vector<1x32xf32>
    %94 = vector.broadcast %93 : vector<1x32xf32> to vector<8x32xf32>
    %95 = arith.addf %92, %94 : vector<8x32xf32>
    %96 = arith.addf %25, %95 : vector<8x32xf32>
    %c0_35 = arith.constant 0 : index
    %c0_36 = arith.constant 0 : index
    %97 = vector.load %arg12[%c0_35, %c0_36] : memref<1x32xf32, #tpu.memory_space<vmem>>, vector<1x32xf32>
    %c0_37 = arith.constant 0 : index
    %c0_38 = arith.constant 0 : index
    %98 = vector.load %arg13[%c0_37, %c0_38] : memref<1x32xf32, #tpu.memory_space<vmem>>, vector<1x32xf32>
    %cst_39 = arith.constant dense<0.000000e+00> : vector<8xf32>
    %99 = vector.multi_reduction <add>, %96, %cst_39 [1] : vector<8x32xf32> to vector<8xf32>
    %100 = vector.shape_cast %99 : vector<8xf32> to vector<8x1xf32>
    %cst_40 = arith.constant 3.200000e+01 : f32
    %101 = vector.broadcast %cst_40 : f32 to vector<8x1xf32>
    %102 = arith.divf %100, %101 : vector<8x1xf32>
    %103 = vector.broadcast %102 : vector<8x1xf32> to vector<8x32xf32>
    %104 = arith.subf %96, %103 : vector<8x32xf32>
    %105 = arith.mulf %104, %104 : vector<8x32xf32>
    %cst_41 = arith.constant dense<0.000000e+00> : vector<8xf32>
    %106 = vector.multi_reduction <add>, %105, %cst_41 [1] : vector<8x32xf32> to vector<8xf32>
    %107 = vector.shape_cast %106 : vector<8xf32> to vector<8x1xf32>
    %cst_42 = arith.constant 3.200000e+01 : f32
    %108 = vector.broadcast %cst_42 : f32 to vector<8x1xf32>
    %109 = arith.divf %107, %108 : vector<8x1xf32>
    %110 = vector.broadcast %102 : vector<8x1xf32> to vector<8x32xf32>
    %111 = arith.subf %96, %110 : vector<8x32xf32>
    %cst_43 = arith.constant 9.99999974E-6 : f32
    %112 = vector.broadcast %cst_43 : f32 to vector<8x1xf32>
    %113 = arith.addf %109, %112 : vector<8x1xf32>
    %114 = math.rsqrt %113 : vector<8x1xf32>
    %115 = vector.broadcast %114 : vector<8x1xf32> to vector<8x32xf32>
    %116 = arith.mulf %111, %115 : vector<8x32xf32>
    %117 = vector.broadcast %97 : vector<1x32xf32> to vector<8x32xf32>
    %118 = arith.mulf %116, %117 : vector<8x32xf32>
    %119 = vector.broadcast %98 : vector<1x32xf32> to vector<8x32xf32>
    %120 = arith.addf %118, %119 : vector<8x32xf32>
    %c0_44 = arith.constant 0 : index
    %c0_45 = arith.constant 0 : index
    %121 = vector.load %arg14[%c0_44, %c0_45] : memref<32x64xf32, #tpu.memory_space<vmem>>, vector<32x64xf32>
    %cst_46 = arith.constant dense<0.000000e+00> : vector<8x64xf32>
    %122 = tpu.matmul %120, %121, %cst_46 {dimension_numbers = #tpu.dot_dimension_numbers<[1], [0], [0], [1], [0, 0, 1, 1], [], []>} : vector<8x32xf32>, vector<32x64xf32>, vector<8x64xf32> -> vector<8x64xf32>
    %c0_47 = arith.constant 0 : index
    %c0_48 = arith.constant 0 : index
    %123 = vector.load %arg15[%c0_47, %c0_48] : memref<1x64xf32, #tpu.memory_space<vmem>>, vector<1x64xf32>
    %124 = vector.broadcast %123 : vector<1x64xf32> to vector<8x64xf32>
    %125 = arith.addf %122, %124 : vector<8x64xf32>
    %cst_49 = arith.constant 5.000000e-01 : f32
    %126 = vector.broadcast %cst_49 : f32 to vector<8x64xf32>
    %127 = arith.mulf %126, %125 : vector<8x64xf32>
    %cst_50 = arith.constant 0.707106769 : f32
    %128 = vector.broadcast %cst_50 : f32 to vector<8x64xf32>
    %129 = arith.mulf %125, %128 : vector<8x64xf32>
    %130 = math.absf %129 : vector<8x64xf32>
    %cst_51 = arith.constant 0.327591091 : f32
    %131 = vector.broadcast %cst_51 : f32 to vector<8x64xf32>
    %132 = arith.mulf %131, %130 : vector<8x64xf32>
    %cst_52 = arith.constant 1.000000e+00 : f32
    %133 = vector.broadcast %cst_52 : f32 to vector<8x64xf32>
    %134 = arith.addf %133, %132 : vector<8x64xf32>
    %cst_53 = arith.constant 1.000000e+00 : f32
    %135 = vector.broadcast %cst_53 : f32 to vector<8x64xf32>
    %136 = arith.divf %135, %134 : vector<8x64xf32>
    %cst_54 = arith.constant 1.06140542 : f32
    %137 = vector.broadcast %cst_54 : f32 to vector<8x64xf32>
    %138 = arith.mulf %137, %136 : vector<8x64xf32>
    %cst_55 = arith.constant -1.45315206 : f32
    %139 = vector.broadcast %cst_55 : f32 to vector<8x64xf32>
    %140 = arith.addf %138, %139 : vector<8x64xf32>
    %141 = arith.mulf %140, %136 : vector<8x64xf32>
    %cst_56 = arith.constant 1.42141378 : f32
    %142 = vector.broadcast %cst_56 : f32 to vector<8x64xf32>
    %143 = arith.addf %141, %142 : vector<8x64xf32>
    %144 = arith.mulf %143, %136 : vector<8x64xf32>
    %cst_57 = arith.constant -0.284496725 : f32
    %145 = vector.broadcast %cst_57 : f32 to vector<8x64xf32>
    %146 = arith.addf %144, %145 : vector<8x64xf32>
    %147 = arith.mulf %146, %136 : vector<8x64xf32>
    %cst_58 = arith.constant 0.254829586 : f32
    %148 = vector.broadcast %cst_58 : f32 to vector<8x64xf32>
    %149 = arith.addf %147, %148 : vector<8x64xf32>
    %150 = arith.mulf %149, %136 : vector<8x64xf32>
    %cst_59 = arith.constant 0.000000e+00 : f32
    %151 = vector.broadcast %cst_59 : f32 to vector<8x64xf32>
    %152 = arith.subf %151, %130 : vector<8x64xf32>
    %153 = arith.mulf %152, %130 : vector<8x64xf32>
    %154 = math.exp %153 : vector<8x64xf32>
    %155 = arith.mulf %150, %154 : vector<8x64xf32>
    %cst_60 = arith.constant 1.000000e+00 : f32
    %156 = vector.broadcast %cst_60 : f32 to vector<8x64xf32>
    %157 = arith.subf %156, %155 : vector<8x64xf32>
    %cst_61 = arith.constant 0.000000e+00 : f32
    %158 = vector.broadcast %cst_61 : f32 to vector<8x64xf32>
    %159 = arith.cmpf oge, %129, %158 : vector<8x64xf32>
    %cst_62 = arith.constant 0.000000e+00 : f32
    %160 = vector.broadcast %cst_62 : f32 to vector<8x64xf32>
    %161 = arith.subf %160, %157 : vector<8x64xf32>
    %162 = arith.select %159, %157, %161 : vector<8x64xi1>, vector<8x64xf32>
    %cst_63 = arith.constant 1.000000e+00 : f32
    %163 = vector.broadcast %cst_63 : f32 to vector<8x64xf32>
    %164 = arith.addf %163, %162 : vector<8x64xf32>
    %165 = arith.mulf %127, %164 : vector<8x64xf32>
    %c0_64 = arith.constant 0 : index
    %c0_65 = arith.constant 0 : index
    %166 = vector.load %arg16[%c0_64, %c0_65] : memref<64x32xf32, #tpu.memory_space<vmem>>, vector<64x32xf32>
    %cst_66 = arith.constant dense<0.000000e+00> : vector<8x32xf32>
    %167 = tpu.matmul %165, %166, %cst_66 {dimension_numbers = #tpu.dot_dimension_numbers<[1], [0], [0], [1], [0, 0, 1, 1], [], []>} : vector<8x64xf32>, vector<64x32xf32>, vector<8x32xf32> -> vector<8x32xf32>
    %c0_67 = arith.constant 0 : index
    %c0_68 = arith.constant 0 : index
    %168 = vector.load %arg17[%c0_67, %c0_68] : memref<1x32xf32, #tpu.memory_space<vmem>>, vector<1x32xf32>
    %169 = vector.broadcast %168 : vector<1x32xf32> to vector<8x32xf32>
    %170 = arith.addf %167, %169 : vector<8x32xf32>
    %171 = arith.addf %120, %170 : vector<8x32xf32>
    %c0_69 = arith.constant 0 : index
    %c0_70 = arith.constant 0 : index
    %172 = vector.load %arg18[%c0_69, %c0_70] : memref<1x32xf32, #tpu.memory_space<vmem>>, vector<1x32xf32>
    %c0_71 = arith.constant 0 : index
    %c0_72 = arith.constant 0 : index
    %173 = vector.load %arg19[%c0_71, %c0_72] : memref<1x32xf32, #tpu.memory_space<vmem>>, vector<1x32xf32>
    %cst_73 = arith.constant dense<0.000000e+00> : vector<8xf32>
    %174 = vector.multi_reduction <add>, %171, %cst_73 [1] : vector<8x32xf32> to vector<8xf32>
    %175 = vector.shape_cast %174 : vector<8xf32> to vector<8x1xf32>
    %cst_74 = arith.constant 3.200000e+01 : f32
    %176 = vector.broadcast %cst_74 : f32 to vector<8x1xf32>
    %177 = arith.divf %175, %176 : vector<8x1xf32>
    %178 = vector.broadcast %177 : vector<8x1xf32> to vector<8x32xf32>
    %179 = arith.subf %171, %178 : vector<8x32xf32>
    %180 = arith.mulf %179, %179 : vector<8x32xf32>
    %cst_75 = arith.constant dense<0.000000e+00> : vector<8xf32>
    %181 = vector.multi_reduction <add>, %180, %cst_75 [1] : vector<8x32xf32> to vector<8xf32>
    %182 = vector.shape_cast %181 : vector<8xf32> to vector<8x1xf32>
    %cst_76 = arith.constant 3.200000e+01 : f32
    %183 = vector.broadcast %cst_76 : f32 to vector<8x1xf32>
    %184 = arith.divf %182, %183 : vector<8x1xf32>
    %185 = vector.broadcast %177 : vector<8x1xf32> to vector<8x32xf32>
    %186 = arith.subf %171, %185 : vector<8x32xf32>
    %cst_77 = arith.constant 9.99999974E-6 : f32
    %187 = vector.broadcast %cst_77 : f32 to vector<8x1xf32>
    %188 = arith.addf %184, %187 : vector<8x1xf32>
    %189 = math.rsqrt %188 : vector<8x1xf32>
    %190 = vector.broadcast %189 : vector<8x1xf32> to vector<8x32xf32>
    %191 = arith.mulf %186, %190 : vector<8x32xf32>
    %192 = vector.broadcast %172 : vector<1x32xf32> to vector<8x32xf32>
    %193 = arith.mulf %191, %192 : vector<8x32xf32>
    %194 = vector.broadcast %173 : vector<1x32xf32> to vector<8x32xf32>
    %195 = arith.addf %193, %194 : vector<8x32xf32>
    %c0_78 = arith.constant 0 : index
    %c0_79 = arith.constant 0 : index
    %c0_80 = arith.constant 0 : index
    %196 = vector.load %arg20[%c0_78, %c0_79, %c0_80] : memref<1x8x32xf32, #tpu.memory_space<vmem>>, vector<1x8x32xf32>
    %197 = vector.shape_cast %196 : vector<1x8x32xf32> to vector<8x32xf32>
    %198 = vector.shape_cast %195 : vector<8x32xf32> to vector<1x8x32xf32>
    tpu.vector_store %arg20[%c0_78, %c0_79, %c0_80], %198 {strides = array<i32>} : memref<1x8x32xf32, #tpu.memory_space<vmem>>, vector<1x8x32xf32>,
    return
  }
  func.func @transform_0(%arg0: i32) -> (i32, i32, i32) {
    %c0_i32 = arith.constant 0 : i32
    %c0_i32_0 = arith.constant 0 : i32
    %c0_i32_1 = arith.constant 0 : i32
    return %arg0, %c0_i32, %c0_i32_0 : i32, i32, i32
  }
  func.func @transform_1(%arg0: i32) -> (i32, i32) {
    %c0_i32 = arith.constant 0 : i32
    %c0_i32_0 = arith.constant 0 : i32
    %c0_i32_1 = arith.constant 0 : i32
    return %c0_i32, %c0_i32_0 : i32, i32
  }
  func.func @transform_2(%arg0: i32) -> (i32, i32) {
    %c0_i32 = arith.constant 0 : i32
    %c0_i32_0 = arith.constant 0 : i32
    %c0_i32_1 = arith.constant 0 : i32
    return %c0_i32, %c0_i32_0 : i32, i32
  }
  func.func @transform_3(%arg0: i32) -> (i32, i32) {
    %c0_i32 = arith.constant 0 : i32
    %c0_i32_0 = arith.constant 0 : i32
    %c0_i32_1 = arith.constant 0 : i32
    return %c0_i32, %c0_i32_0 : i32, i32
  }
  func.func @transform_4(%arg0: i32) -> (i32, i32) {
    %c0_i32 = arith.constant 0 : i32
    %c0_i32_0 = arith.constant 0 : i32
    %c0_i32_1 = arith.constant 0 : i32
    return %c0_i32, %c0_i32_0 : i32, i32
  }
  func.func @transform_5(%arg0: i32) -> (i32, i32) {
    %c0_i32 = arith.constant 0 : i32
    %c0_i32_0 = arith.constant 0 : i32
    %c0_i32_1 = arith.constant 0 : i32
    return %c0_i32, %c0_i32_0 : i32, i32
  }
  func.func @transform_6(%arg0: i32) -> (i32, i32) {
    %c0_i32 = arith.constant 0 : i32
    %c0_i32_0 = arith.constant 0 : i32
    %c0_i32_1 = arith.constant 0 : i32
    return %c0_i32, %c0_i32_0 : i32, i32
  }
  func.func @transform_7(%arg0: i32) -> (i32, i32) {
    %c0_i32 = arith.constant 0 : i32
    %c0_i32_0 = arith.constant 0 : i32
    %c0_i32_1 = arith.constant 0 : i32
    return %c0_i32, %c0_i32_0 : i32, i32
  }
  func.func @transform_8(%arg0: i32) -> (i32, i32) {
    %c0_i32 = arith.constant 0 : i32
    %c0_i32_0 = arith.constant 0 : i32
    %c0_i32_1 = arith.constant 0 : i32
    return %c0_i32, %c0_i32_0 : i32, i32
  }
  func.func @transform_9(%arg0: i32) -> (i32, i32, i32) {
    %c0_i32 = arith.constant 0 : i32
    %c0_i32_0 = arith.constant 0 : i32
    %c0_i32_1 = arith.constant 0 : i32
    %c0_i32_2 = arith.constant 0 : i32
    return %c0_i32, %c0_i32_0, %c0_i32_1 : i32, i32, i32
  }
  func.func @transform_10(%arg0: i32) -> (i32, i32) {
    %c0_i32 = arith.constant 0 : i32
    %c0_i32_0 = arith.constant 0 : i32
    %c0_i32_1 = arith.constant 0 : i32
    return %c0_i32, %c0_i32_0 : i32, i32
  }
  func.func @transform_11(%arg0: i32) -> (i32, i32) {
    %c0_i32 = arith.constant 0 : i32
    %c0_i32_0 = arith.constant 0 : i32
    %c0_i32_1 = arith.constant 0 : i32
    return %c0_i32, %c0_i32_0 : i32, i32
  }
  func.func @transform_12(%arg0: i32) -> (i32, i32) {
    %c0_i32 = arith.constant 0 : i32
    %c0_i32_0 = arith.constant 0 : i32
    %c0_i32_1 = arith.constant 0 : i32
    return %c0_i32, %c0_i32_0 : i32, i32
  }
  func.func @transform_13(%arg0: i32) -> (i32, i32) {
    %c0_i32 = arith.constant 0 : i32
    %c0_i32_0 = arith.constant 0 : i32
    %c0_i32_1 = arith.constant 0 : i32
    return %c0_i32, %c0_i32_0 : i32, i32
  }
  func.func @transform_14(%arg0: i32) -> (i32, i32) {
    %c0_i32 = arith.constant 0 : i32
    %c0_i32_0 = arith.constant 0 : i32
    %c0_i32_1 = arith.constant 0 : i32
    return %c0_i32, %c0_i32_0 : i32, i32
  }
  func.func @transform_15(%arg0: i32) -> (i32, i32) {
    %c0_i32 = arith.constant 0 : i32
    %c0_i32_0 = arith.constant 0 : i32
    %c0_i32_1 = arith.constant 0 : i32
    return %c0_i32, %c0_i32_0 : i32, i32
  }
  func.func @transform_16(%arg0: i32) -> (i32, i32) {
    %c0_i32 = arith.constant 0 : i32
    %c0_i32_0 = arith.constant 0 : i32
    %c0_i32_1 = arith.constant 0 : i32
    return %c0_i32, %c0_i32_0 : i32, i32
  }
  func.func @transform_17(%arg0: i32) -> (i32, i32) {
    %c0_i32 = arith.constant 0 : i32
    %c0_i32_0 = arith.constant 0 : i32
    %c0_i32_1 = arith.constant 0 : i32
    return %c0_i32, %c0_i32_0 : i32, i32
  }
  func.func @transform_18(%arg0: i32) -> (i32, i32) {
    %c0_i32 = arith.constant 0 : i32
    %c0_i32_0 = arith.constant 0 : i32
    %c0_i32_1 = arith.constant 0 : i32
    return %c0_i32, %c0_i32_0 : i32, i32
  }
  func.func @transform_19(%arg0: i32) -> (i32, i32, i32) {
    %c0_i32 = arith.constant 0 : i32
    %c0_i32_0 = arith.constant 0 : i32
    %c0_i32_1 = arith.constant 0 : i32
    return %arg0, %c0_i32, %c0_i32_0 : i32, i32, i32
  }
}

</mosaic_0001>

<bundles_post_ra>
// kernel: tpu_custom_call.1
= control target key start
LH: loop header
LB: loop body
LE: loop exit
PB: predicated region body
PF: predicated region fallthrough
CT: control target
= control target key end

     0   :  { %s3322_s0 = inlined_call_operand.hbm [shape: f32[2,8,32], index: 0, kind: input, shape index: {}]   ;;  %s3323_s1 = inlined_call_operand.vmem [shape: f32[1,32], index: 1, kind: input, shape index: {}]   ;;  %s3324_s2 = inlined_call_operand.vmem [shape: f32[1,32], index: 2, kind: input, shape index: {}]   ;;  %s3325_s3 = inlined_call_operand.vmem [shape: f32[32,32], index: 3, kind: input, shape index: {}]   ;;  %s3326_s4 = inlined_call_operand.vmem [shape: f32[1,32], index: 4, kind: input, shape index: {}]   ;;  %s3327_s5 = inlined_call_operand.vmem [shape: f32[32,32], index: 5, kind: input, shape index: {}]   ;;  %s3328_s6 = inlined_call_operand.vmem [shape: f32[1,32], index: 6, kind: input, shape index: {}]   ;;  %s3329_s7 = inlined_call_operand.vmem [shape: f32[32,32], index: 7, kind: input, shape index: {}]   ;;  %s3330_s8 = inlined_call_operand.vmem [shape: f32[1,32], index: 8, kind: input, shape index: {}]   ;;  %s3331_s9 = inlined_call_operand.hbm [shape: f32[4,8,32], index: 9, kind: input, shape index: {}]   ;;  %s3332_s10 = inlined_call_operand.vmem [shape: f32[1,32], index: 10, kind: input, shape index: {}]   ;;  %s3333_s11 = inlined_call_operand.vmem [shape: f32[1,32], index: 11, kind: input, shape index: {}]   ;;  %s3334_s12 = inlined_call_operand.vmem [shape: f32[1,32], index: 12, kind: input, shape index: {}]   ;;  %s3335_s13 = inlined_call_operand.hbm [shape: f32[32,64], index: 13, kind: input, shape index: {}]   ;;  %s3336_s14 = inlined_call_operand.vmem [shape: f32[1,64], index: 14, kind: input, shape index: {}]   ;;  %s3337_s15 = inlined_call_operand.vmem [shape: f32[64,32], index: 15, kind: input, shape index: {}]   ;;  %s3338_s16 = inlined_call_operand.vmem [shape: f32[1,32], index: 16, kind: input, shape index: {}]   ;;  %s3339_s17 = inlined_call_operand.vmem [shape: f32[1,32], index: 17, kind: input, shape index: {}]   ;;  %s3340_s18 = inlined_call_operand.vmem [shape: f32[1,32], index: 18, kind: input, shape index: {}]   ;;  %s3341_s19 = inlined_call_operand.hbm [shape: f32[2,8,32], index: 19, kind: output, shape index: {}]  }
   0x1   :  { %3352 = sst [smem:[#allocation14_spill]] %s3322_s0 }
   0x2   :  { %3353 = sst [smem:[#allocation15_spill]] %s3323_s1 }
   0x3   :  { %3354 = sst [smem:[#allocation16_spill]] %s3324_s2 }
   0x4   :  { %3355 = sst [smem:[#allocation17_spill]] %s3325_s3 }
   0x5   :  { %3356 = sst [smem:[#allocation18_spill]] %s3326_s4 }
   0x6   :  { %3357 = sst [smem:[#allocation19_spill]] %s3327_s5 }
   0x7   :  { %3358 = sst [smem:[#allocation20_spill]] %s3331_s9 }
   0x8   :  { %3359 = sst [smem:[#allocation21_spill]] %s3336_s14 }
   0x9   :  { %3360 = sst [smem:[#allocation22_spill]] %s3338_s16 }
   0xa   :  { %3361 = sst [smem:[#allocation23_spill]] %s3339_s17 }
   0xb   :  { %3362 = sst [smem:[#allocation24_spill]] %s3340_s18 }
   0xc   :  { %3363 = sst [smem:[#allocation25_spill]] %s3341_s19 }
   0xd   :  { %24 = vsyncpa [#allocation3], 0 }
   0xe   :  { %26 = vsyncpa [#allocation3 + $0x1], 0 }
   0xf   :  { %27 = vsyncpa [#allocation6], 0 }
  0x10   :  { %28 = vsyncpa [#allocation4], 0 }
  0x11   :  { %30 = vsyncpa [#allocation4 + $0x1], 0  ;;  %s2885_s0 = smov 0   ;;  %s2887_s30 = smov 0  }
  0x12   :  { %s2889_s20 = smov 0   ;;  %s2891_s21 = smov 0  }
  0x13 LB: > { %3364 = sst [smem:[#allocation12_spill]] %s2759_s0  ;;  %s2906_s1 = sadd.s32 4294967295, %s2771_s21   ;;  %s2771_s21 = sphi %s2891_s21, %s3397_s21   ;;  %s2767_s20 = sphi %s2889_s20, %s3396_s20   ;;  %s2763_s30 = sphi %s2887_s30, %s3395_s30   ;;  %s2759_s0 = sphi %s2885_s0, %s3394_s0  }
  0x14   : > { %s2253_s22 = sadd.s32 4294967294, %s2771_s21   ;;  %p56_p0 = scmp.ne.s32.totalorder %s2763_s30, %s2759_s0 }
  0x15   : > { %p3347_p1 = scmp.eq.s32.totalorder %s2906_s1, 0  ;;  %p464_p3 = scmp.eq.s32.totalorder %s2253_s22, 1 }
  0x16   : > { %p2254_p5 = scmp.ge.s32.totalorder %s2771_s21, 1  ;;  %p471_p7 = scmp.lt.s32.totalorder %s2771_s21, 3 }
  0x17   : > { %p2915_p4 = por %p3347_p1, %p56_p0  ;;  %p2920_p6 = por %p464_p3, %p56_p0 }
  0x18   : > { %p2925_p8 = pnand %p2254_p5, %p471_p7  ;;  %s2773_s25 = smov [#allocation5]  }
  0x19   : > { %s3365_s2 = scalar_select %p2915_p4, 1, 0 }
  0x1a   : > { %s3366_s23 = scalar_select %p2920_p6, 1, 0 }
  0x1b   : > { %s507_s3 = sshll.u32 %s2773_s25, 4  ;;  %p2526_p9 = pneg %p2925_p8  ;;  %s2929_s3 = int_to_ptr.vmem [resolvable:$true] %s507_s3 }
  0x1c   : > { %3367 = sst [smem:[#allocation13_spill]] %s3366_s23  ;;  %s2774_s27 = smov [#allocation7]  }
  0x1d   : > { %p2936_p11 = pnand %p2526_p9, %p3347_p1  ;;  %s529_s28 = sshll.u32 %s2774_s27, 4  ;;  %s2940_s28 = int_to_ptr.vmem [resolvable:$true] %s529_s28 }
  0x1e   : > { %s3370_s9 = sld [smem:[#allocation20_spill]] }
  0x1f   : > { %p2617_p13 = pneg %p2936_p11 }
  0x24   : > { %s2615_s25 = scalar_lea.hbm %s3370_s9, 512 }
  0x25   : > { %p2616_p12 = scmp.ne.s32.totalorder %s3370_s9, %s2615_s25  ;;  %p2622_p5 = scmp.lt.u32.totalorder %s2615_s25, %s3370_s9 }
  0x27   : > { %p2618_p0 = pnand %p2617_p13, %p2616_p12 }
  0x29   : > { %p2619_p3 = pneg %p2618_p0 }
  0x2b   : > { %p2624_p7 = pnand %p2622_p5, %p2619_p3 }
  0x2d   : > { %2627 = shalt.err (!%p2624_p7)
}
  0x2e   : > { %s2628_s27 = scalar_lea.vmem %s2929_s3, 512  ;;  %p2636_p2 = scmp.lt.s32.totalorder %s2929_s3, %s2929_s3 }
  0x2f   : > { %p2629_p9 = scmp.ne.s32.totalorder %s2929_s3, %s2628_s27  ;;  %p2637_p12 = scmp.lt.s32.totalorder %s2628_s27, %s2628_s27 }
  0x31   : > { %p2631_p10 = pnand %p2629_p9, %p2617_p13  ;;  %p2638_p0 = por %p2637_p12, %p2636_p2 }
  0x33   : > { %p2632_p1 = pneg %p2631_p10 }
  0x35   : > { %p2639_p6 = pnand %p2638_p0, %p2632_p1 }
  0x37   : > { %2642 = shalt.err (!%p2639_p6)
}
  0x38   : > { %s2775_s18 = smov 128   ;;  %s2776_s19 = smov 8  }
  0x39   : > { %2529 = dma.hbm_to_vmem [thread:$0]  (!%p2936_p11), %s3370_s9, 512, %s2929_s3, [#allocation6], %s2775_s18, %s2775_s18, %s2776_s19  }
  0x3a   : > { %s2643_s25 = scalar_lea.hbm %s3335_s13, 512 }
  0x3b   : > { %p2644_p2 = scmp.ne.s32.totalorder %s3335_s13, %s2643_s25  ;;  %p2650_p10 = scmp.lt.u32.totalorder %s2643_s25, %s3335_s13 }
  0x3d   : > { %p2646_p1 = pnand %p2644_p2, %p2617_p13 }
  0x3f   : > { %p2647_p6 = pneg %p2646_p1 }
  0x41   : > { %p2652_p3 = pnand %p2650_p10, %p2647_p6 }
  0x43   : > { %2655 = shalt.err (!%p2652_p3)
}
  0x44   : > { %s2656_s3 = scalar_lea.vmem %s2940_s28, 512  ;;  %p2664_p12 = scmp.lt.s32.totalorder %s2940_s28, %s2940_s28 }
  0x45   : > { %p2657_p5 = scmp.ne.s32.totalorder %s2940_s28, %s2656_s3  ;;  %p2665_p0 = scmp.lt.s32.totalorder %s2656_s3, %s2656_s3 }
  0x47   : > { %p2659_p7 = pnand %p2657_p5, %p2617_p13  ;;  %p2666_p2 = por %p2665_p0, %p2664_p12 }
  0x49   : > { %p2660_p9 = pneg %p2659_p7 }
  0x4b   : > { %p2667_p1 = pnand %p2666_p2, %p2660_p9 }
  0x4d   : > { %2670 = shalt.err (!%p2667_p1)
}
  0x4e   : > { %2532 = dma.hbm_to_vmem [thread:$0]  (!%p2936_p11), %s3335_s13, 512, %s2940_s28, [#allocation6], %s2775_s18, %s2775_s18, %s2776_s19  }
  0x4f   : > { %s2995_s17 = sadd.s32 1, %s2771_s21   ;;  %s43_s26 = sadd.s32 1, %s2767_s20 }
  0x50   : > { %s40_s0 = ssub.s32 %s2771_s21, %s2995_s17  ;;  %p50_p13 = scmp.ne.s32.totalorder %s2767_s20, %s2763_s30 }
  0x51   : > { %p41_p6 = scmp.eq.s32.totalorder %s40_s0, 0  ;;  %p51_p10 = scmp.eq.s32.totalorder %s2771_s21, 0 }
  0x52   : > { %p3371_p3 = scmp.eq.s32.totalorder %s2906_s1, 1  ;;  %p2543_p7 = scmp.lt.s32.totalorder %s2771_s21, 2 }
  0x53   : > { %s3011_s29 = scalar_select %p41_p6, %s2767_s20, %s43_s26  }
  0x54   : > { %p3005_p5 = por %p3371_p3, %p50_p13  ;;  %p52_p9 = por %p51_p10, %p50_p13 }
  0x55   : > { %s558_s22 = sand.u32 1, %s2767_s20   ;;  %s2259_s28 = sshll.u32 %s2771_s21, 7 }
  0x56   : > { %s3372_s23 = scalar_select %p3005_p5, 1, 0 }
  0x57   : > { %s2258_s25 = sshll.u32 %s558_s22, 3  ;;  %s3373_s27 = sld [smem:[#allocation14_spill]] }
  0x58   : > { %s562_s14 = scalar_lea.vmem [#allocation2], %s2258_s25  ;;  %p3022_p11 = pnand %p2543_p7, %p52_p9 }
  0x59   : > { %s569_s16 = sshll.u32 %s562_s14, 4  ;;  %s559_s0 = scalar_lea.sflag [#allocation3], %s558_s22  ;;  %s3020_s16 = int_to_ptr.vmem [resolvable:$true] %s569_s16 }
  0x5a   : > { %p2673_p0 = pneg %p3022_p11 }
  0x5d   : > { %s3018_s3 = scalar_lea.hbm %s3373_s27, %s2259_s28  ;;  %s2676_s18 = scalar_lea.hbm %s3373_s27, 256 }
  0x5e   : > { %s2671_s9 = scalar_lea.hbm %s3018_s3, 128  ;;  %p2677_p13 = scmp.lt.u32.totalorder %s3018_s3, %s3373_s27 }
  0x5f   : > { %p2672_p12 = scmp.ne.s32.totalorder %s3018_s3, %s2671_s9  ;;  %p2678_p6 = scmp.lt.u32.totalorder %s2676_s18, %s2671_s9 }
  0x60   : > { %p2680_p3 = scmp.lt.u32.totalorder %s2671_s9, %s3018_s3 }
  0x61   : > { %p2674_p2 = pnand %p2673_p0, %p2672_p12  ;;  %p2679_p10 = por %p2678_p6, %p2677_p13 }
  0x63   : > { %p2675_p1 = pneg %p2674_p2  ;;  %p2681_p7 = por %p2680_p3, %p2679_p10 }
  0x65   : > { %p2682_p9 = pnand %p2681_p7, %p2675_p1 }
  0x67   : > { %2685 = shalt.err (!%p2682_p9)
}
  0x68   : > { %s2686_s22 = scalar_lea.vmem %s3020_s16, 128  ;;  %s2777_s28 = smov [#allocation2]  }
  0x69   : > { %p2687_p12 = scmp.ne.s32.totalorder %s3020_s16, %s2686_s22  ;;  %s2691_s25 = sshll.u32 %s2777_s28, 4  ;;  %s2692_s25 = int_to_ptr.vmem [resolvable:$false] %s2691_s25 }
  0x6a   : > { %s2693_s19 = scalar_lea.vmem %s2692_s25, 256  ;;  %p2694_p4 = scmp.lt.s32.totalorder %s3020_s16, %s2692_s25 }
  0x6b   : > { %p2689_p2 = pnand %p2687_p12, %p2673_p0  ;;  %p2695_p13 = scmp.lt.s32.totalorder %s2693_s19, %s2686_s22 }
  0x6d   : > { %p2690_p5 = pneg %p2689_p2  ;;  %p2696_p6 = por %p2695_p13, %p2694_p4 }
  0x6f   : > { %p2697_p10 = pnand %p2696_p6, %p2690_p5 }
  0x71   : > { %2700 = shalt.err (!%p2697_p10)
}
  0x72   : > { %2536 = dma.hbm_to_vmem [thread:$0]  (!%p3022_p11), %s3018_s3, 128, %s3020_s16, %s559_s0  }
  0x73   : > { %578 = sbr.rel (%p2925_p8) target bundleno = 2899 (0xb53), region = 96  ;;  %s3054_s9 = sand.u32 (!%p2925_p8), 1, %s2763_s30  }
  0x74   : > { %s3350_s18 = sshll.u32 (!%p2925_p8), %s3054_s9, 3  ;;  %s581_s14 = scalar_lea.sflag (!%p2925_p8), [#allocation3], %s3054_s9 }
  0x75   : > { %s584_s22 = scalar_lea.vmem (!%p2925_p8), [#allocation2], %s3350_s18  ;;  %p3375_p4 = scmp.ne.s32.totalorder (!%p2925_p8), %s3365_s2, 0 }
  0x7a   : > { %2746 = dma.done.wait (%p3375_p4), %s581_s14, 128  }
  0x7b   : > { %2748 = vsyncadd (%p3375_p4), %s581_s14, 4294967168  ;;  %p3376_p5 = scmp.eq.s32.totalorder %s2906_s1, 0 }
  0x7d   : > { %2750 = dma.done.wait (%p3376_p5), [#allocation6], 1024   ;;  %p3377_p8 = pmov %p3376_p5 }
  0x7e   : > { %vm650_vm0 = vcmask 261120   ;;  %v647_v0 = vld [vmem:[%s584_s22] sm:$0xff]  ;;  %s3378_s3 = sld [smem:[#allocation17_spill]]  ;;  %s3379_s5 = sld [smem:[#allocation19_spill]]  ;;  %v2778_v10 = vmov 0.0|0.0   ;;  %vm2779_vm1 = vmmov 0  }
  0x7f   : > { %2752 = vsyncadd (%p3377_p8), [#allocation6], 4294966272  ;;  %v651_v1 = vsel %vm650_vm0, %v647_v0, 0.0  ;;  %2478 = vmatprep.subr.bf16.mxu0 %v2778_v10  ;;  %2484 = vmatprep.subr.bf16.mxu1 %v2778_v10  ;;  %v2780_v18 = vmov 0.0   ;;  %s3380_s14 = sld [smem:[#allocation15_spill]]  ;;  %v844_v27 = vld [vmem:[%s3329_s7] sm:$0xff] }
  0x80   : > { %652 = vadd.xlane.f32.xlu0 %v651_v1  ;;  %2363 = vmatprep.mubr.msk.f32.mxu0 %vm2779_vm1, %v2780_v18  ;;  %v845_v28 = vld [vmem:[%s3329_s7 + $0x8] sm:$0xff]  ;;  %s3381_s28 = sld [smem:[#allocation16_spill]]  ;;  %v846_v33 = vld [vmem:[%s3329_s7 + $0x10] sm:$0xff]  ;;  %v847_v34 = vld [vmem:[%s3329_s7 + $0x18] sm:$0xff]  ;;  %s3382_s4 = sld [smem:[#allocation18_spill]]  ;;  %vm949_vm2 = vcmask 64512  }
  0x81   : > { %2374 = vmatprep.mubr.msk.f32.mxu1 %vm2779_vm1, %v2780_v18  ;;  %v2491_v31 = vpack.c.bf16 %v845_v28, %v844_v27  ;;  %v2494_v35 = vpack.c.bf16 %v847_v34, %v846_v33  ;;  %v2269_v37 = vld [vmem:[%s3328_s6] ss:$0 sm:$0xff]  ;;  %s2781_s16 = smov 120   ;;  %s2782_s26 = smov 112   ;;  %vm2045_vm4 = vcmask 523264  }
  0x82   : > { %s2783_s0 = smov 104   ;;  %v2271_v50 = vld [vmem:[%s3330_s8] ss:$0 sm:$0xff]  ;;  %s3383_s18 = sld [smem:[#allocation21_spill]] }
  0x83   : > { %s3384_s24 = sld [smem:[#allocation22_spill]]  ;;  %s3386_s19 = sld [smem:[#allocation24_spill]] }
  0x84   : > { %v679_v7 = vld [vmem:[%s3378_s3] sm:$0xff]  ;;  %v680_v8 = vld [vmem:[%s3378_s3 + $0x8] sm:$0xff]  ;;  %v681_v13 = vld [vmem:[%s3378_s3 + $0x10] sm:$0xff]  ;;  %p3389_p0 = scmp.ne.s32.totalorder %s3372_s23, 0 }
  0x85   : > { %v763_v9 = vld [vmem:[%s3379_s5] sm:$0xff]  ;;  %v2479_v11 = vpack.c.bf16 %v680_v8, %v679_v7  ;;  %v764_v12 = vld [vmem:[%s3379_s5 + $0x8] sm:$0xff]  ;;  %v682_v14 = vld [vmem:[%s3378_s3 + $0x18] sm:$0xff] }
  0x86   : > { %v2485_v15 = vpack.c.bf16 %v764_v12, %v763_v9  ;;  %v765_v16 = vld [vmem:[%s3379_s5 + $0x10] sm:$0xff]  ;;  %v766_v17 = vld [vmem:[%s3379_s5 + $0x18] sm:$0xff]  ;;  %v2482_v19 = vpack.c.bf16 %v682_v14, %v681_v13  ;;  %v2265_v25 = vld [vmem:[%s3380_s14] ss:$0 sm:$0xff]  ;;  %s2299_s14 = sshll.u32 %s2906_s1, 7  ;;  %s2784_s1 = smov [#allocation8]  }
  0x87   : > { %2480 = vmatpush3.bf16.msra.mxu0 %v2479_v11  ;;  %v2488_v20 = vpack.c.bf16 %v766_v17, %v765_v16  ;;  %v2266_v29 = vld [vmem:[%s3381_s28] ss:$0 sm:$0xff] }
  0x88   : > { %2486 = vmatpush3.bf16.msra.mxu1 %v2485_v15  ;;  %2481 = vmatprep.subr.bf16.mxu0 %v2778_v10  ;;  %v2267_v36 = vld [vmem:[%s3382_s4] ss:$0 sm:$0xff]  ;;  %s3388_s4 = sld [smem:[#allocation25_spill]] }
  0x89   : > { %2487 = vmatprep.subr.bf16.mxu1 %v2778_v10 }
  0x8b   : > { %2483 = vmatpush3.bf16.msra.mxu0 %v2482_v19 }
  0x8c   : > { %2489 = vmatpush3.bf16.msra.mxu1 %v2488_v20  ;;  %2490 = vmatprep.subr.bf16.mxu0 %v2778_v10 }
  0x8d   : > { %2393 = vmatprep.subr.mxu1 %v2780_v18 }
  0x8e   : > { %s3277_s5 = scalar_lea.hbm %s3388_s4, %s2299_s14 }
 0x10d   : > { %v653_v2 = vpop.xlane.xlu0 %652 }
 0x10e   : > { %v655_v3 = vmul.f32 0.03125, %v653_v2 }
 0x110   : > { %v656_v4 = vsub.f32 %v647_v0, %v655_v3 }
 0x112   : > { %v657_v5 = vmul.f32 %v656_v4, %v656_v4 }
 0x114   : > { %v658_v6 = vsel %vm650_vm0, %v657_v5, 0.0 }
 0x115   : > { %659 = vadd.xlane.f32.xlu0 %v658_v6 }
 0x1a2   : > { %v660_v21 = vpop.xlane.xlu0 %659 }
 0x1a3   : > { %v661_v22 = vmul.f32 0.03125, %v660_v21 }
 0x1a5   : > { %v662_v23 = vadd.f32 1e-05, %v661_v22 }
 0x1a7   : > { %2589 = vrsqrt.f32 %v662_v23 }
 0x1b1   : > { %v2590_v24 = vpop.eup %2589 }
 0x1b2   : > { %v664_v26 = vmul.f32 %v2590_v24, %v656_v4 }
 0x1b4   : > { %v671_v30 = vmul.f32 %v2265_v25, %v664_v26 }
 0x1b6   : > { %v3116_v32 = vadd.f32 %v2266_v29, %v671_v30 }
 0x1b8   : > { %2364 = vmatmul.mubr.msk.f32.vlgmr.msra.gmra.mrb[0].mxu0 %vm650_vm0, %v3116_v32  ;;  %2375 = vmatmul.mubr.msk.f32.vlgmr.msra.gmra.mrb[0].mxu1 %vm650_vm0, %v3116_v32 }
 0x1b9   : > { %2492 = vmatpush3.bf16.msra.mxu0 %v2491_v31  ;;  %2385 = vmatprep.mubr.msk.f32.mxu0 %vm2779_vm1, %v2780_v18 }
 0x1ba   : > { %2493 = vmatprep.subr.bf16.mxu0 %v2778_v10  ;;  %2395 = vmatprep.mubr.msk.f32.mxu1 %vm2779_vm1, %v2780_v18 }
 0x1bd   : > { %2495 = vmatpush3.bf16.msra.mxu0 %v2494_v35 }
 0x1be   : > { %2388 = vmatprep.subr.mxu0 %v2780_v18 }
 0x1c0   : > { %2386 = vmatmul.mubr.msk.f32.vlgmr.msra.gmra.mrb[2].mxu0 %vm650_vm0, %v3116_v32 }
 0x1c1   : > { %2390 = vmatprep.mubr.msk.f32.mxu0 %vm2779_vm1, %v2780_v18 }
 0x28b   : > { %v759_v38 = vpop.f32.mrb[0].mxu0  ;;  %v840_v39 = vpop.f32.mrb[0].mxu1 }
 0x28c   : > { %v760_v40 = vadd.f32 %v2267_v36, %v759_v38  ;;  %v841_v41 = vadd.f32 %v2269_v37, %v840_v39  ;;  %v2365_v42 = vpop.f32.mrb[1].mxu0  ;;  %v2376_v43 = vpop.f32.mrb[1].mxu1  ;;  %v1582_v36 = vld [vmem:[#allocation5] sm:$0xff] }
 0x28d   : > { %v1584_v42 = vld [vmem:[#allocation5 + $0x10] sm:$0xff] }
 0x28e   : > { %933 = vrot.lane.b32.xlu1 %v841_v41, %s2781_s16  ;;  %2389 = vmatpush3.xpose.msk.msra.mxu0 %vm949_vm2, %v841_v41 }
 0x28f   : > { %926 = vrot.lane.b32.xlu0 %v760_v40, %s2781_s16  ;;  %2398 = vmatprep.subr.mxu0 %v2780_v18 }
 0x291   : > { %2391 = vmatmul.mubr.msk.f32.vlgmr.msra.gmra.mrb[4].mxu0 %vm949_vm2, %v760_v40 }
 0x292   : > { %935 = vrot.lane.b32.xlu1 %v841_v41, %s2782_s26  ;;  %2400 = vmatprep.mubr.msk.f32.mxu0 %vm2779_vm1, %v2780_v18 }
 0x293   : > { %v921_v44 = vpop.f32.mrb[2].mxu0 }
 0x294   : > { %v2387_v45 = vpop.f32.mrb[3].mxu0  ;;  %v922_v51 = vadd.f32 %v2271_v50, %v921_v44 }
 0x295   : > { %v1585_v45 = vld [vmem:[#allocation5 + $0x18] sm:$0xff] }
 0x296   : > { %937 = vrot.lane.b32.xlu1 %v841_v41, %s2783_s0  ;;  %v1583_v41 = vld [vmem:[#allocation5 + $0x8] sm:$0xff] }
 0x29a   : > { %928 = vrot.lane.b32.xlu1 %v760_v40, %s2782_s26 }
 0x29e   : > { %930 = vrot.lane.b32.xlu1 %v760_v40, %s2783_s0 }
 0x300   : > { %v934_v46 = vpop.permute.xlu1 %933 }
 0x301   : > { %2394 = vmatpush3.xpose.msk.msra.mxu1 %vm949_vm2, %v934_v46  ;;  %v927_v47 = vpop.permute.xlu0 %926 }
 0x302   : > { %2403 = vmatprep.subr.mxu1 %v2780_v18 }
 0x304   : > { %v936_v48 = vpop.permute.xlu1 %935  ;;  %2396 = vmatmul.mubr.msk.f32.vlgmr.msra.gmra.mrb[2].mxu1 %vm949_vm2, %v927_v47 }
 0x305   : > { %2399 = vmatpush3.xpose.msk.msra.mxu0 %vm949_vm2, %v936_v48  ;;  %2405 = vmatprep.mubr.msk.f32.mxu1 %vm2779_vm1, %v2780_v18 }
 0x306   : > { %2408 = vmatprep.subr.mxu0 %v2780_v18 }
 0x308   : > { %v938_v49 = vpop.permute.xlu1 %937 }
 0x309   : > { %2404 = vmatpush3.xpose.msk.msra.mxu1 %vm949_vm2, %v938_v49 }
 0x30a   : > { %2413 = vmatprep.subr.mxu1 %v2780_v18 }
 0x30c   : > { %v929_v52 = vpop.permute.xlu1 %928 }
 0x30d   : > { %2401 = vmatmul.mubr.msk.f32.vlgmr.msra.gmra.mrb[6].mxu0 %vm949_vm2, %v929_v52 }
 0x30e   : > { %2409 = vmatpush3.msra.mxu0 %v922_v51  ;;  %2410 = vmatprep.mubr.msk.f32.mxu0 %vm2779_vm1, %v2780_v18 }
 0x30f   : > { %2418 = vmatprep.subr.mxu0 %v2780_v18 }
 0x310   : > { %v931_v53 = vpop.permute.xlu1 %930 }
 0x311   : > { %2406 = vmatmul.mubr.msk.f32.vlgmr.msra.gmra.mrb[4].mxu1 %vm949_vm2, %v931_v53 }
 0x312   : > { %2415 = vmatprep.mubr.msk.f32.mxu1 %vm2779_vm1, %v2780_v18 }
 0x364   : > { %v1020_v54 = vpop.f32.mrb[4].mxu0 }
 0x365   : > { %v2392_v55 = vpop.f32.mrb[5].mxu0  ;;  %v1246_v56 = vsel %vm949_vm2, %v1020_v54, -inf }
 0x366   : > { %1247 = vmax.xlane.f32.xlu1 %v1246_v56 }
 0x3d7   : > { %v1094_v57 = vpop.f32.mrb[2].mxu1 }
 0x3d8   : > { %v2397_v58 = vpop.f32.mrb[3].mxu1  ;;  %v1249_v59 = vsel %vm949_vm2, %v1094_v57, -inf }
 0x3d9   : > { %1250 = vmax.xlane.f32.xlu0 %v1249_v59 }
 0x3e0   : > { %v1168_v60 = vpop.f32.mrb[6].mxu0 }
 0x3e1   : > { %v2402_v61 = vpop.f32.mrb[7].mxu0  ;;  %v1252_v62 = vsel %vm949_vm2, %v1168_v60, -inf }
 0x3e2   : > { %1253 = vmax.xlane.f32.xlu1 %v1252_v62  ;;  %v2289_v61 = vld [vmem:[%s3332_s10] ss:$0 sm:$0xff] }
 0x3e4   : > { %v1242_v63 = vpop.f32.mrb[4].mxu1 }
 0x3e5   : > { %v2407_v0 = vpop.f32.mrb[5].mxu1  ;;  %v1255_v1 = vsel %vm949_vm2, %v1242_v63, -inf }
 0x3e6   : > { %1256 = vmax.xlane.f32.xlu1 %v1255_v1 }
 0x3f3   : > { %v1248_v2 = vpop.xlane.xlu1 %1247 }
 0x3f4   : > { %v1258_v3 = vsub.f32 %v1020_v54, %v1248_v2 }
 0x3f6   : > { %v1262_v4 = vmul.f32 1.442695, %v1258_v3 }
 0x3f8   : > { %2591 = vpow2.f32 %v1262_v4 }
 0x402   : > { %v2592_v5 = vpop.eup %2591 }
 0x403   : > { %v1270_v6 = vsel %vm949_vm2, %v2592_v5, 0.0 }
 0x404   : > { %1271 = vadd.xlane.f32.xlu0 %v1270_v6 }
 0x466   : > { %v1251_v7 = vpop.xlane.xlu0 %1250 }
 0x467   : > { %v1259_v8 = vsub.f32 %v1094_v57, %v1251_v7  ;;  %v1919_v7 = vld [vmem:[#allocation7] sm:$0xff] }
 0x469   : > { %v1264_v9 = vmul.f32 1.442695, %v1259_v8  ;;  %v1920_v8 = vld [vmem:[#allocation7 + $0x8] sm:$0xff] }
 0x46b   : > { %2593 = vpow2.f32 %v1264_v9  ;;  %v2497_v9 = vpack.c.bf16 %v1920_v8, %v1919_v7 }
 0x46f   : > { %v1254_v11 = vpop.xlane.xlu1 %1253 }
 0x470   : > { %v1260_v12 = vsub.f32 %v1168_v60, %v1254_v11  ;;  %v1921_v11 = vld [vmem:[#allocation7 + $0x10] sm:$0xff] }
 0x472   : > { %v1266_v13 = vmul.f32 1.442695, %v1260_v12  ;;  %v1922_v12 = vld [vmem:[#allocation7 + $0x18] sm:$0xff] }
 0x473   : > { %v1257_v20 = vpop.xlane.xlu1 %1256 }
 0x474   : > { %2595 = vpow2.f32 %v1266_v13  ;;  %v1261_v21 = vsub.f32 %v1242_v63, %v1257_v20  ;;  %v2500_v13 = vpack.c.bf16 %v1922_v12, %v1921_v11  ;;  %v2291_v20 = vld [vmem:[%s3334_s12] ss:$0 sm:$0xff] }
 0x475   : > { %v2594_v14 = vpop.eup %2593 }
 0x476   : > { %v1273_v15 = vsel %vm949_vm2, %v2594_v14, 0.0  ;;  %v1268_v22 = vmul.f32 1.442695, %v1261_v21 }
 0x477   : > { %1274 = vadd.xlane.f32.xlu1 %v1273_v15 }
 0x47e   : > { %v2596_v16 = vpop.eup %2595 }
 0x47f   : > { %v1276_v17 = vsel %vm949_vm2, %v2596_v16, 0.0 }
 0x480   : > { %1277 = vadd.xlane.f32.xlu0 %v1276_v17  ;;  %v2290_v17 = vld [vmem:[%s3333_s11] ss:$0 sm:$0xff] }
 0x488   : > { %943 = vrot.lane.b32.xlu1 %v922_v51, %s2782_s26 }
 0x491   : > { %v1272_v19 = vpop.xlane.xlu0 %1271 }
 0x492   : > { %2597 = vrcp.f32 %v1272_v19 }
 0x493   : > { %2599 = vpow2.f32 %v1268_v22 }
 0x496   : > { %940 = vrot.lane.b32.xlu0 %v922_v51, %s2781_s16  ;;  %s2151_s16 = scalar_lea.sflag [#allocation4], %s3054_s9 }
 0x49c   : > { %v2598_v23 = vpop.eup %2597 }
 0x49d   : > { %v1286_v24 = vmul.f32 %v2598_v23, %v2592_v5  ;;  %v2600_v25 = vpop.eup %2599  ;;  %v2030_v23 = vld [vmem:[%s3337_s15] sm:$0xff] }
 0x49e   : > { %v1279_v26 = vsel %vm949_vm2, %v2600_v25, 0.0 }
 0x49f   : > { %2411 = vmatmul.mubr.msk.f32.vlgmr.msra.gmra.mrb[8].mxu0 %vm949_vm2, %v1286_v24  ;;  %v2031_v24 = vld [vmem:[%s3337_s15 + $0x8] sm:$0xff] }
 0x4a0   : > { %2420 = vmatprep.mubr.msk.f32.mxu0 %vm2779_vm1, %v2780_v18 }
 0x4ac   : > { %1280 = vadd.xlane.f32.xlu1 %v1279_v26  ;;  %v2032_v26 = vld [vmem:[%s3337_s15 + $0x10] sm:$0xff] }
 0x4bd   : > { %946 = vrot.lane.b32.xlu1 %v922_v51, %s2783_s0  ;;  %s3385_s0 = sld [smem:[#allocation23_spill]] }
 0x504   : > { %v1275_v27 = vpop.xlane.xlu1 %1274 }
 0x505   : > { %2601 = vrcp.f32 %v1275_v27  ;;  %v2033_v27 = vld [vmem:[%s3337_s15 + $0x18] sm:$0xff] }
 0x508   : > { %v944_v28 = vpop.permute.xlu1 %943 }
 0x509   : > { %2419 = vmatpush3.msra.mxu0 %v944_v28  ;;  %v2506_v28 = vpack.c.bf16 %v2033_v27, %v2032_v26 }
 0x50a   : > { %2428 = vmatprep.subr.mxu0 %v2780_v18 }
 0x50d   : > { %v1278_v29 = vpop.xlane.xlu0 %1277 }
 0x50e   : > { %2603 = vrcp.f32 %v1278_v29  ;;  %v2034_v29 = vld [vmem:[%s3337_s15 + $0x20] sm:$0xff] }
 0x50f   : > { %v2602_v30 = vpop.eup %2601 }
 0x510   : > { %v1287_v31 = vmul.f32 %v2602_v30, %v2594_v14  ;;  %v2035_v30 = vld [vmem:[%s3337_s15 + $0x28] sm:$0xff] }
 0x511   : > { %v941_v33 = vpop.permute.xlu0 %940 }
 0x512   : > { %2414 = vmatpush3.msra.mxu1 %v941_v33  ;;  %v2036_v33 = vld [vmem:[%s3337_s15 + $0x30] sm:$0xff] }
 0x513   : > { %2416 = vmatmul.mubr.msk.f32.vlgmr.msra.gmra.mrb[6].mxu1 %vm949_vm2, %v1287_v31  ;;  %2423 = vmatprep.subr.mxu1 %v2780_v18  ;;  %v2509_v31 = vpack.c.bf16 %v2035_v30, %v2034_v29 }
 0x514   : > { %2425 = vmatprep.mubr.msk.f32.mxu1 %vm2779_vm1, %v2780_v18 }
 0x518   : > { %v2604_v34 = vpop.eup %2603 }
 0x519   : > { %v1288_v35 = vmul.f32 %v2604_v34, %v2596_v16  ;;  %v2037_v34 = vld [vmem:[%s3337_s15 + $0x38] sm:$0xff] }
 0x51b   : > { %2421 = vmatmul.mubr.msk.f32.vlgmr.msra.gmra.mrb[10].mxu0 %vm949_vm2, %v1288_v35  ;;  %v2512_v35 = vpack.c.bf16 %v2037_v34, %v2036_v33 }
 0x51c   : > { %2429 = vmatpush3.msra.mxu0 %v1582_v36  ;;  %2430 = vmatprep.mubr.msk.f32.mxu0 %vm2779_vm1, %v2780_v18  ;;  %v2292_v36 = vld [vmem:[%s3383_s18] ss:$0 sm:$0xff]  ;;  %s3387_s18 = sshll.u32 %s3054_s9, 3 }
 0x51d   : > { %2438 = vmatprep.subr.mxu0 %v2780_v18  ;;  %s646_s22 = scalar_lea.vmem [#allocation8], %s3387_s18 }
 0x51e   : > { %s2164_s2 = sshll.u32 %s646_s22, 4  ;;  %s3279_s2 = int_to_ptr.vmem [resolvable:$true] %s2164_s2 }
 0x51f   : > { %s2701_s26 = scalar_lea.vmem %s3279_s2, 128 }
 0x520   : > { %p2702_p11 = scmp.ne.s32.totalorder %s3279_s2, %s2701_s26 }
 0x522   : > { %p2703_p1 = pnand %p2702_p11, %p3389_p0 }
 0x524   : > { %p2704_p3 = pneg %p2703_p1 }
 0x539   : > { %v1281_v37 = vpop.xlane.xlu1 %1280 }
 0x53a   : > { %2605 = vrcp.f32 %v1281_v37 }
 0x53d   : > { %v947_v38 = vpop.permute.xlu1 %946 }
 0x53e   : > { %2424 = vmatpush3.msra.mxu1 %v947_v38 }
 0x53f   : > { %2433 = vmatprep.subr.mxu1 %v2780_v18 }
 0x544   : > { %v2606_v39 = vpop.eup %2605 }
 0x545   : > { %v1289_v40 = vmul.f32 %v2606_v39, %v2600_v25  ;;  %v2503_v25 = vpack.c.bf16 %v2031_v24, %v2030_v23 }
 0x547   : > { %2426 = vmatmul.mubr.msk.f32.vlgmr.msra.gmra.mrb[8].mxu1 %vm949_vm2, %v1289_v40 }
 0x548   : > { %2435 = vmatprep.mubr.msk.f32.mxu1 %vm2779_vm1, %v2780_v18  ;;  %2434 = vmatpush3.msra.mxu1 %v1583_v41 }
 0x549   : > { %2443 = vmatprep.subr.mxu1 %v2780_v18 }
 0x572   : > { %v1359_v43 = vpop.f32.mrb[8].mxu0 }
 0x573   : > { %v2412_v44 = vpop.f32.mrb[9].mxu0  ;;  %2431 = vmatmul.mubr.msk.f32.vlgmr.msra.gmra.mrb[12].mxu0 %vm949_vm2, %v1359_v43 }
 0x574   : > { %2439 = vmatpush3.msra.mxu0 %v1584_v42  ;;  %2440 = vmatprep.mubr.msk.f32.mxu0 %vm2779_vm1, %v2780_v18 }
 0x575   : > { %2496 = vmatprep.subr.bf16.mxu0 %v2778_v10 }
 0x5e6   : > { %v1432_v46 = vpop.f32.mrb[6].mxu1 }
 0x5e7   : > { %v2417_v47 = vpop.f32.mrb[7].mxu1  ;;  %2436 = vmatmul.mubr.msk.f32.vlgmr.msra.gmra.mrb[10].mxu1 %vm949_vm2, %v1432_v46 }
 0x5e8   : > { %2444 = vmatpush3.msra.mxu1 %v1585_v45  ;;  %2445 = vmatprep.mubr.msk.f32.mxu1 %vm2779_vm1, %v2780_v18 }
 0x5e9   : > { %2502 = vmatprep.subr.bf16.mxu1 %v2778_v10 }
 0x5ee   : > { %v1505_v48 = vpop.f32.mrb[10].mxu0 }
 0x5ef   : > { %v2422_v49 = vpop.f32.mrb[11].mxu0  ;;  %2441 = vmatmul.mubr.msk.f32.vlgmr.msra.gmra.mrb[14].mxu0 %vm949_vm2, %v1505_v48 }
 0x5f0   : > { %2456 = vmatprep.mubr.msk.f32.mxu0 %vm2779_vm1, %v2780_v18  ;;  %2498 = vmatpush3.bf16.msra.mxu0 %v2497_v9 }
 0x5f1   : > { %2499 = vmatprep.subr.bf16.mxu0 %v2778_v10 }
 0x5f4   : > { %2501 = vmatpush3.bf16.msra.mxu0 %v2500_v13 }
 0x61a   : > { %v1578_v50 = vpop.f32.mrb[8].mxu1 }
 0x61b   : > { %v2427_v51 = vpop.f32.mrb[9].mxu1  ;;  %2446 = vmatmul.mubr.msk.f32.vlgmr.msra.gmra.mrb[12].mxu1 %vm949_vm2, %v1578_v50 }
 0x61c   : > { %2475 = vmatprep.mubr.msk.f32.mxu1 %vm2779_vm1, %v2780_v18  ;;  %2504 = vmatpush3.bf16.msra.mxu1 %v2503_v25 }
 0x61d   : > { %2505 = vmatprep.subr.bf16.mxu1 %v2778_v10 }
 0x620   : > { %2507 = vmatpush3.bf16.msra.mxu1 %v2506_v28 }
 0x621   : > { %2508 = vmatprep.subr.bf16.mxu1 %v2778_v10 }
 0x624   : > { %2510 = vmatpush3.bf16.msra.mxu1 %v2509_v31 }
 0x625   : > { %2511 = vmatprep.subr.bf16.mxu1 %v2778_v10 }
 0x628   : > { %2513 = vmatpush3.bf16.msra.mxu1 %v2512_v35 }
 0x646   : > { %v1655_v52 = vpop.f32.mrb[12].mxu0 }
 0x647   : > { %v2432_v53 = vpop.f32.mrb[13].mxu0 }
 0x6ba   : > { %v1728_v54 = vpop.f32.mrb[10].mxu1 }
 0x6bb   : > { %v1878_v55 = vadd.f32 %v1728_v54, %v1655_v52  ;;  %v2437_v56 = vpop.f32.mrb[11].mxu1 }
 0x6c2   : > { %v1801_v57 = vpop.f32.mrb[14].mxu0 }
 0x6c3   : > { %v1879_v58 = vadd.f32 %v1878_v55, %v1801_v57  ;;  %v2442_v59 = vpop.f32.mrb[15].mxu0 }
 0x6ee   : > { %v1874_v60 = vpop.f32.mrb[12].mxu1 }
 0x6ef   : > { %v1880_v62 = vadd.f32 %v1879_v58, %v1874_v60  ;;  %v2447_v63 = vpop.f32.mrb[13].mxu1 }
 0x6f1   : > { %v1888_v0 = vadd.f32 %v2289_v61, %v1880_v62 }
 0x6f3   : > { %v1889_v1 = vadd.f32 %v1888_v0, %v3116_v32  ;;  %v2294_v0 = vld [vmem:[%s3384_s24] ss:$0 sm:$0xff] }
 0x6f5   : > { %v1892_v18 = vsel %vm650_vm0, %v1889_v1, 0.0 }
 0x6f6   : > { %1893 = vadd.xlane.f32.xlu0 %v1892_v18 }
 0x783   : > { %v1894_v2 = vpop.xlane.xlu0 %1893 }
 0x784   : > { %v1895_v3 = vmul.f32 0.03125, %v1894_v2 }
 0x786   : > { %v1896_v4 = vsub.f32 %v1889_v1, %v1895_v3 }
 0x788   : > { %v1897_v5 = vmul.f32 %v1896_v4, %v1896_v4 }
 0x78a   : > { %v1898_v6 = vsel %vm650_vm0, %v1897_v5, 0.0 }
 0x78b   : > { %1899 = vadd.xlane.f32.xlu1 %v1898_v6 }
 0x818   : > { %v1900_v32 = vpop.xlane.xlu1 %1899 }
 0x819   : > { %v1901_v14 = vmul.f32 0.03125, %v1900_v32 }
 0x81b   : > { %v1902_v15 = vadd.f32 1e-05, %v1901_v14  ;;  %v2296_v14 = vld [vmem:[%s3385_s0] ss:$0 sm:$0xff]  ;;  %s2705_s0 = sshll.u32 %s2784_s1, 4  ;;  %s2706_s0 = int_to_ptr.vmem [resolvable:$false] %s2705_s0 }
 0x81c   : > { %s2707_s28 = scalar_lea.vmem %s2706_s0, 256  ;;  %p2708_p7 = scmp.lt.s32.totalorder %s3279_s2, %s2706_s0 }
 0x81d   : > { %2607 = vrsqrt.f32 %v1902_v15  ;;  %p2709_p9 = scmp.lt.s32.totalorder %s2707_s28, %s2701_s26 }
 0x81f   : > { %p2710_p12 = por %p2709_p9, %p2708_p7 }
 0x821   : > { %p2711_p2 = pnand %p2710_p12, %p2704_p3 }
 0x827   : > { %v2608_v16 = vpop.eup %2607 }
 0x828   : > { %v1904_v19 = vmul.f32 %v2608_v16, %v1896_v4  ;;  %v2297_v16 = vld [vmem:[%s3386_s19] ss:$0 sm:$0xff] }
 0x82a   : > { %v1911_v21 = vmul.f32 %v2290_v17, %v1904_v19 }
 0x82c   : > { %v1918_v22 = vadd.f32 %v2291_v20, %v1911_v21 }
 0x82e   : > { %2457 = vmatmul.mubr.msk.f32.vlgmr.msra.gmra.mrb[16].mxu0 %vm650_vm0, %v1918_v22 }
 0x901   : > { %v1999_v37 = vpop.f32.mrb[16].mxu0 }
 0x902   : > { %v2000_v38 = vadd.f32 %v2292_v36, %v1999_v37  ;;  %v2458_v39 = vpop.f32.mrb[17].mxu0 }
 0x904   : > { %v2004_v40 = vmul.f32 0.70710677, %v2000_v38  ;;  %v2003_v61 = vmul.f32 0.5, %v2000_v38 }
 0x906   : > { %v2005_v41 = vand.u32 2147483647, %v2004_v40  ;;  %vm2025_vm3 = vcmp.ge.f32.partialorder %v2004_v40, 0.0 }
 0x908   : > { %v2006_v10 = vmul.f32 0.3275911, %v2005_v41  ;;  %v2019_v43 = vsub.f32 0.0, %v2005_v41 }
 0x90a   : > { %v2007_v42 = vadd.f32 1.0, %v2006_v10  ;;  %v2020_v45 = vmul.f32 %v2019_v43, %v2005_v41 }
 0x90c   : > { %2609 = vrcp.f32 %v2007_v42  ;;  %v2021_v48 = vmul.f32 1.442695, %v2020_v45 }
 0x90e   : > { %2611 = vpow2.f32 %v2021_v48 }
 0x916   : > { %v2610_v44 = vpop.eup %2609 }
 0x917   : > { %v2010_v46 = vmul.f32 1.0614054, %v2610_v44 }
 0x918   : > { %v2612_v56 = vpop.eup %2611 }
 0x919   : > { %v2011_v47 = vadd.f32 -1.4531521, %v2010_v46 }
 0x91b   : > { %v2012_v49 = vmul.f32 %v2610_v44, %v2011_v47 }
 0x91d   : > { %v2013_v50 = vadd.f32 1.4214138, %v2012_v49 }
 0x91f   : > { %v2014_v51 = vmul.f32 %v2610_v44, %v2013_v50 }
 0x921   : > { %v2015_v52 = vadd.f32 -0.28449672, %v2014_v51 }
 0x923   : > { %v2016_v53 = vmul.f32 %v2610_v44, %v2015_v52 }
 0x925   : > { %v2017_v54 = vadd.f32 0.2548296, %v2016_v53 }
 0x927   : > { %v2018_v55 = vmul.f32 %v2610_v44, %v2017_v54 }
 0x929   : > { %v2023_v57 = vmul.f32 %v2612_v56, %v2018_v55 }
 0x92b   : > { %v2024_v58 = vsub.f32 1.0, %v2023_v57 }
 0x92d   : > { %v2026_v59 = vsub.f32 0.0, %v2024_v58 }
 0x92f   : > { %v2027_v60 = vsel %vm2025_vm3, %v2024_v58, %v2026_v59 }
 0x930   : > { %v2028_v62 = vadd.f32 1.0, %v2027_v60 }
 0x932   : > { %v2029_v63 = vmul.f32 %v2028_v62, %v2003_v61 }
 0x934   : > { %2476 = vmatmul.mubr.msk.f32.vlgmr.msra.gmra.mrb[14].mxu1 %vm2045_vm4, %v2029_v63 }
 0xa07   : > { %v2115_v1 = vpop.f32.mrb[14].mxu1 }
 0xa08   : > { %v2116_v18 = vadd.f32 %v2294_v0, %v2115_v1  ;;  %v2477_v2 = vpop.f32.mrb[15].mxu1 }
 0xa0a   : > { %v2119_v3 = vadd.f32 %v2116_v18, %v1918_v22 }
 0xa0c   : > { %v2122_v4 = vsel %vm650_vm0, %v2119_v3, 0.0 }
 0xa0d   : > { %2123 = vadd.xlane.f32.xlu0 %v2122_v4 }
 0xa9a   : > { %v2124_v5 = vpop.xlane.xlu0 %2123 }
 0xa9b   : > { %v2125_v6 = vmul.f32 0.03125, %v2124_v5 }
 0xa9d   : > { %v2126_v7 = vsub.f32 %v2119_v3, %v2125_v6 }
 0xa9f   : > { %v2127_v8 = vmul.f32 %v2126_v7, %v2126_v7 }
 0xaa1   : > { %v2128_v9 = vsel %vm650_vm0, %v2127_v8, 0.0 }
 0xaa2   : > { %2129 = vadd.xlane.f32.xlu0 %v2128_v9 }
 0xb2f   : > { %v2130_v11 = vpop.xlane.xlu0 %2129 }
 0xb30   : > { %v2131_v12 = vmul.f32 0.03125, %v2130_v11 }
 0xb32   : > { %v2132_v13 = vadd.f32 1e-05, %v2131_v12 }
 0xb34   : > { %2613 = vrsqrt.f32 %v2132_v13 }
 0xb3e   : > { %v2614_v32 = vpop.eup %2613 }
 0xb3f   : > { %v2134_v15 = vmul.f32 %v2614_v32, %v2126_v7 }
 0xb41   : > { %v2141_v17 = vmul.f32 %v2296_v14, %v2134_v15 }
 0xb43   : > { %v2148_v19 = vadd.f32 %v2297_v16, %v2141_v17 }
 0xb45   : > { %2149 = vst.msk [vmem:[%s646_s22] sm:$0xff] %vm650_vm0, %v2148_v19 }
 0xb46   : > { %2714 = shalt.err (!%p2711_p2)
}
 0xb47   : > { %s2715_s9 = scalar_lea.hbm %s3277_s5, 128  ;;  %s2719_s19 = scalar_lea.hbm %s3388_s4, 256 }
 0xb48   : > { %p2716_p13 = scmp.ne.s32.totalorder %s3277_s5, %s2715_s9  ;;  %p2720_p4 = scmp.lt.u32.totalorder %s3277_s5, %s3388_s4 }
 0xb49   : > { %p2721_p5 = scmp.lt.u32.totalorder %s2719_s19, %s2715_s9  ;;  %p2723_p11 = scmp.lt.u32.totalorder %s2715_s9, %s3277_s5 }
 0xb4a   : > { %p2717_p6 = pnand %p2716_p13, %p3389_p0 }
 0xb4b   : > { %p2722_p8 = por %p2721_p5, %p2720_p4 }
 0xb4c   : > { %p2718_p10 = pneg %p2717_p6 }
 0xb4d   : > { %p2724_p1 = por %p2723_p11, %p2722_p8 }
 0xb4f   : > { %p2725_p3 = pnand %p2724_p1, %p2718_p10 }
 0xb51   : > { %2728 = shalt.err (!%p2725_p3)
}
 0xb52   : > { %2524 = dma.vmem_to_hbm [thread:$0]  (%p3389_p0), %s3279_s2, 128, %s3277_s5, %s2151_s16  }
 0xb53 PF: > { %s3390_s22 = sld [smem:[#allocation12_spill]]  ;;  %s3391_s24 = sld [smem:[#allocation13_spill]] }
 0xb54   : > { %p3393_p9 = scmp.ge.s32.totalorder %s2771_s21, 2 }
 0xb59   : > { %s2176_s26 = sand.u32 1, %s3390_s22   ;;  %p3392_p7 = scmp.ne.s32.totalorder %s3391_s24, 0 }
 0xb5a   : > { %s2177_s1 = scalar_lea.sflag [#allocation4], %s2176_s26 }
 0xb5b   : > { %p2538_p12 = pnand %p3393_p9, %p3392_p7 }
 0xb5d   : > { %2754 = dma.done.wait (!%p2538_p12), %s2177_s1, 128  }
 0xb5e   : > { %2756 = vsyncadd (!%p2538_p12), %s2177_s1, 4294967168  ;;  %p33_p2 = scmp.ge.s32.totalorder %s2995_s17, 4   ;;  %s3394_s0 = smov %s2763_s30 }
 0xb5f   : > { %s3395_s30 = smov %s2767_s20  ;;  %s3396_s20 = smov %s3011_s29 }
 0xb60   : > { %s3397_s21 = smov %s2995_s17  ;;  %35 = sbr.rel (!%p33_p2) target bundleno = 19 (0x13), region = 149 }
 0xb67   :  { %2182 = vsyncpa [#allocation3], 1 }
 0xb68   :  { %2184 = vsyncpa [#allocation3 + $0x1], 1 }
 0xb69   :  { %2185 = vsyncpa [#allocation6], 1 }
 0xb6a   :  { %2186 = vsyncpa [#allocation4], 1 }
 0xb6b   :  { %2188 = vsyncpa [#allocation4 + $0x1], 1 }

</bundles_post_ra>
